<compile_context>
chip_gen: v6e
topology: v6e:2x2x1
jax: 0.10.0
libtpu: 0.0.40
codegen_flags: <defaults>
</compile_context>

<pallas_src>
import functools

import jax
import jax.numpy as jnp
from jax.experimental import pallas as pl
from jax.experimental.pallas import tpu as pltpu

SELU_ALPHA = 1.6732632423543772
SELU_SCALE = 1.0507009873554805

LANE = 128
SUBLANE = 8


def _round_up(x, m):
    return ((x + m - 1) // m) * m


def _vae_encoder_kernel(x_ref, w1_ref, b1_ref, w23_ref, b23_ref, eps_ref,
                        out_ref, *, latent):
    L = latent

    # --- linear1: x arrives as f32, bf16 cast happens here (no extra HBM pass
    # in the wrapper); MXU accumulates in f32. -------------------------------
    x16 = x_ref[...].astype(jnp.bfloat16)
    h = jnp.dot(x16, w1_ref[...],
                preferred_element_type=jnp.float32) + b1_ref[...]

    # --- SELU *without* the outer scale: SELU_SCALE is folded into W23 at
    # pack time, saving a full-width (TB x width_1) VPU multiply per tile. ----
    h = jnp.where(h > 0.0, h, SELU_ALPHA * (jnp.exp(h) - 1.0))

    # --- fused (pre-scaled) mu || log_sigma projection: one 128-lane matmul --
    #   lanes [0, L)   -> mu
    #   lanes [L, 2L)  -> log_sigma
    #   lanes [2L,128) -> zero padding
    y = jnp.dot(h.astype(w23_ref.dtype), w23_ref[...],
                preferred_element_type=jnp.float32) + b23_ref[...]
    mu = y[:, :L]
    log_sigma = y[:, L:2 * L]
    sigma = jnp.exp(log_sigma)

    # --- reparameterization & per-row KL (uses log_sigma directly) ----------
    z = mu + sigma * eps_ref[...]
    kl_row = jnp.sum(sigma * sigma + mu * mu - log_sigma - 0.5,
                     axis=1, keepdims=True)

    # --- lane-dense (TB, 128) output slab: one dense writeback DMA ----------
    out_ref[...] = jnp.zeros_like(out_ref)
    out_ref[:, :L] = z.astype(out_ref.dtype)
    out_ref[:, L:L + 1] = kl_row.astype(out_ref.dtype)


def pack_params(params):
    """One-time weight prep: fused W2||W3 packing, SELU-scale fold, bf16 casts.

    Hoisted out of the per-call path so it runs once, not on every forward.
    """
    w1, b1, w2, b2, w3, b3 = params
    D, W1h = w1.shape
    L = w2.shape[1]
    # Keep NP = 128 for L <= 64; padding further only adds dead MXU pushes.
    NP = _round_up(2 * L, LANE)

    w23 = jnp.zeros((W1h, NP), jnp.float32)
    w23 = w23.at[:, :L].set(SELU_SCALE * w2).at[:, L:2 * L].set(SELU_SCALE * w3)
    b23 = jnp.zeros((1, NP), jnp.float32)
    b23 = b23.at[:, :L].set(b2).at[:, L:2 * L].set(b3)

    return {
        "w1": w1.astype(jnp.bfloat16),      # bf16 storage, f32 MXU accumulate
        "b1": b1.astype(jnp.float32).reshape(1, W1h),
        "w23": w23.astype(jnp.bfloat16),
        "b23": b23,
        "latent": L,
        "np_lanes": NP,
    }


def variational_encoder(x_nchw, packed, eps, *, tile_b=512):
    """x_nchw: (B, C, H, W) f32, eps: (B, latent) f32.  Returns (z, kl)."""
    w1 = packed["w1"]
    b1 = packed["b1"]
    w23 = packed["w23"]
    b23 = packed["b23"]
    L = packed["latent"]
    NP = packed["np_lanes"]

    B = x_nchw.shape[0]
    x = x_nchw.reshape(B, -1)               # == torch.flatten(x, start_dim=1)
    D = x.shape[1]
    W1h = w1.shape[1]
    assert w1.shape[0] == D, "flattened input dim does not match W1"
    assert eps.shape == (B, L)

    # Batch tile: large tiles amortize the per-step overhead; when the batch is
    # big enough, keep >= 2 grid steps so the "parallel" axis can shard across
    # v7x's two TensorCores.  No padding of x/eps: full-dim blocks (small B) and
    # partial trailing blocks are handled by Pallas; out-of-range rows never
    # reach the (B, NP)-shaped output.
    if B <= tile_b:
        TB = B
    else:
        TB = min(tile_b, _round_up(pl.cdiv(B, 2), SUBLANE))
    grid = (pl.cdiv(B, TB),)

    kernel = functools.partial(_vae_encoder_kernel, latent=L)

    out = pl.pallas_call(
        kernel,
        out_shape=jax.ShapeDtypeStruct((B, NP), jnp.float32),
        grid=grid,
        in_specs=[
            pl.BlockSpec((TB, D), lambda i: (i, 0)),     # x tile  (pipelined, f32)
            pl.BlockSpec((D, W1h), lambda i: (0, 0)),    # W1      (VMEM resident)
            pl.BlockSpec((1, W1h), lambda i: (0, 0)),    # b1      (resident)
            pl.BlockSpec((W1h, NP), lambda i: (0, 0)),   # W2||W3  (resident, scale-folded)
            pl.BlockSpec((1, NP), lambda i: (0, 0)),     # b2||b3  (resident)
            pl.BlockSpec((TB, L), lambda i: (i, 0)),     # eps tile (pipelined)
        ],
        out_specs=pl.BlockSpec((TB, NP), lambda i: (i, 0)),   # lane-dense slab
        compiler_params=pltpu.CompilerParams(
            dimension_semantics=("parallel",)),
    )(x, w1, b1, w23, b23, eps)

    z = out[:, :L]
    kl = jnp.sum(out[:, L])
    return z, kl


def init_params(key, input_dim, latent_dims, width_1=512):
    """Deterministic synthetic params; weights stored transposed (in, out)."""
    ks = jax.random.split(key, 6)
    s1 = 1.0 / jnp.sqrt(input_dim)
    s2 = 1.0 / jnp.sqrt(width_1)
    w1 = jax.random.uniform(ks[0], (input_dim, width_1), jnp.float32, -s1, s1)
    b1 = jax.random.uniform(ks[1], (1, width_1), jnp.float32, -s1, s1)
    w2 = jax.random.uniform(ks[2], (width_1, latent_dims), jnp.float32, -s2, s2)
    b2 = jax.random.uniform(ks[3], (1, latent_dims), jnp.float32, -s2, s2)
    w3 = jax.random.uniform(ks[4], (width_1, latent_dims), jnp.float32, -s2, s2)
    b3 = jax.random.uniform(ks[5], (1, latent_dims), jnp.float32, -s2, s2)
    return (w1, b1, w2, b2, w3, b3)


def _reference(x_nchw, params, eps):
    """Pure-JAX reference mirroring the kernel numerics (bf16 weights, f32 acc,
    SELU scale folded into the second projection)."""
    x = x_nchw.reshape(x_nchw.shape[0], -1)
    w1, b1, w2, b2, w3, b3 = params
    h = jnp.dot(x.astype(jnp.bfloat16), w1.astype(jnp.bfloat16),
                preferred_element_type=jnp.float32) + b1
    h = jnp.where(h > 0.0, h, SELU_ALPHA * (jnp.exp(h) - 1.0))
    h16 = h.astype(jnp.bfloat16)
    mu = jnp.dot(h16, (SELU_SCALE * w2).astype(jnp.bfloat16),
                 preferred_element_type=jnp.float32) + b2
    log_sigma = jnp.dot(h16, (SELU_SCALE * w3).astype(jnp.bfloat16),
                        preferred_element_type=jnp.float32) + b3
    sigma = jnp.exp(log_sigma)
    z = mu + sigma * eps
    kl = jnp.sum(sigma ** 2 + mu ** 2 - log_sigma - 0.5)
    return z, kl


if __name__ == "__main__":
    # Small shapes consistent with the module: B=2, C=4, H=W=16 -> input_dim=1024
    B, C, H, W = 2, 4, 16, 16
    input_dim = C * H * W
    latent_dims = 32
    width_1 = 512

    key = jax.random.PRNGKey(0)
    k_x, k_p, k_eps = jax.random.split(key, 3)

    x = jax.random.normal(k_x, (B, C, H, W), dtype=jnp.float32)
    params = init_params(k_p, input_dim, latent_dims, width_1)
    # eps plays the role of self.N.sample(mu.shape) in the PyTorch module.
    eps = jax.random.normal(k_eps, (B, latent_dims), dtype=jnp.float32)

    packed = pack_params(params)            # one-time weight prep (hoisted)
    z, kl = variational_encoder(x, packed, eps)
    jax.block_until_ready((z, kl))

    z_ref, kl_ref = _reference(x, params, eps)
    assert z.shape == (B, latent_dims)
    assert jnp.allclose(z, z_ref, atol=2e-3, rtol=2e-3), "z mismatch vs reference"
    assert jnp.allclose(kl, kl_ref, atol=5e-2, rtol=1e-3), "kl mismatch vs reference"

    print("KERNEL_OK")
</pallas_src>

<mosaic_0001>
module attributes {stable_mosaic.version = 11 : i64} {
  func.func @_vae_encoder_kernel(%arg0: i32, %arg1: memref<2x1024xf32, #tpu.memory_space<vmem>>, %arg2: memref<1024x512xbf16, #tpu.memory_space<vmem>>, %arg3: memref<1x512xf32, #tpu.memory_space<vmem>>, %arg4: memref<512x128xbf16, #tpu.memory_space<vmem>>, %arg5: memref<1x128xf32, #tpu.memory_space<vmem>>, %arg6: memref<2x32xf32, #tpu.memory_space<vmem>>, %arg7: memref<2x128xf32, #tpu.memory_space<vmem>>) attributes {dimension_semantics = [#tpu.dimension_semantics<parallel>], iteration_bounds = array<i64: 1>, scalar_prefetch = 0 : i64, scratch_operands = 0 : i64, tpu.core_type = #tpu.core_type<tc>, window_params = [{transform_indices = @transform_0, window_bounds = array<i64: 2, 1024>}, {pipeline_mode = #tpu.pipeline_mode<synchronous>, transform_indices = @transform_1, window_bounds = array<i64: 1024, 512>}, {pipeline_mode = #tpu.pipeline_mode<synchronous>, transform_indices = @transform_2, window_bounds = array<i64: 1, 512>}, {pipeline_mode = #tpu.pipeline_mode<synchronous>, transform_indices = @transform_3, window_bounds = array<i64: 512, 128>}, {pipeline_mode = #tpu.pipeline_mode<synchronous>, transform_indices = @transform_4, window_bounds = array<i64: 1, 128>}, {transform_indices = @transform_5, window_bounds = array<i64: 2, 32>}, {transform_indices = @transform_6, window_bounds = array<i64: 2, 128>}]} {
    %c0 = arith.constant 0 : index
    %c0_0 = arith.constant 0 : index
    %0 = vector.load %arg1[%c0, %c0_0] : memref<2x1024xf32, #tpu.memory_space<vmem>>, vector<2x1024xf32>
    %1 = arith.truncf %0 : vector<2x1024xf32> to vector<2x1024xbf16>
    %c0_1 = arith.constant 0 : index
    %c0_2 = arith.constant 0 : index
    %2 = vector.load %arg2[%c0_1, %c0_2] : memref<1024x512xbf16, #tpu.memory_space<vmem>>, vector<1024x512xbf16>
    %cst = arith.constant dense<0.000000e+00> : vector<2x512xf32>
    %3 = tpu.matmul %1, %2, %cst {dimension_numbers = #tpu.dot_dimension_numbers<[1], [0], [0], [1], [0, 0, 1, 1], [], []>} : vector<2x1024xbf16>, vector<1024x512xbf16>, vector<2x512xf32> -> vector<2x512xf32>
    %c0_3 = arith.constant 0 : index
    %c0_4 = arith.constant 0 : index
    %4 = vector.load %arg3[%c0_3, %c0_4] : memref<1x512xf32, #tpu.memory_space<vmem>>, vector<1x512xf32>
    %5 = vector.broadcast %4 : vector<1x512xf32> to vector<2x512xf32>
    %6 = arith.addf %3, %5 : vector<2x512xf32>
    %cst_5 = arith.constant 0.000000e+00 : f32
    %7 = vector.broadcast %cst_5 : f32 to vector<2x512xf32>
    %8 = arith.cmpf ogt, %6, %7 : vector<2x512xf32>
    %9 = math.exp %6 : vector<2x512xf32>
    %cst_6 = arith.constant 1.000000e+00 : f32
    %10 = vector.broadcast %cst_6 : f32 to vector<2x512xf32>
    %11 = arith.subf %9, %10 : vector<2x512xf32>
    %cst_7 = arith.constant 1.67326319 : f32
    %12 = vector.broadcast %cst_7 : f32 to vector<2x512xf32>
    %13 = arith.mulf %12, %11 : vector<2x512xf32>
    %14 = arith.select %8, %6, %13 : vector<2x512xi1>, vector<2x512xf32>
    %15 = arith.truncf %14 : vector<2x512xf32> to vector<2x512xbf16>
    %c0_8 = arith.constant 0 : index
    %c0_9 = arith.constant 0 : index
    %16 = vector.load %arg4[%c0_8, %c0_9] : memref<512x128xbf16, #tpu.memory_space<vmem>>, vector<512x128xbf16>
    %cst_10 = arith.constant dense<0.000000e+00> : vector<2x128xf32>
    %17 = tpu.matmul %15, %16, %cst_10 {dimension_numbers = #tpu.dot_dimension_numbers<[1], [0], [0], [1], [0, 0, 1, 1], [], []>} : vector<2x512xbf16>, vector<512x128xbf16>, vector<2x128xf32> -> vector<2x128xf32>
    %c0_11 = arith.constant 0 : index
    %c0_12 = arith.constant 0 : index
    %18 = vector.load %arg5[%c0_11, %c0_12] : memref<1x128xf32, #tpu.memory_space<vmem>>, vector<1x128xf32>
    %19 = vector.broadcast %18 : vector<1x128xf32> to vector<2x128xf32>
    %20 = arith.addf %17, %19 : vector<2x128xf32>
    %21 = vector.extract_strided_slice %20 {offsets = [0, 0], sizes = [2, 32], strides = [1, 1]} : vector<2x128xf32> to vector<2x32xf32>
    %22 = vector.extract_strided_slice %20 {offsets = [0, 32], sizes = [2, 32], strides = [1, 1]} : vector<2x128xf32> to vector<2x32xf32>
    %23 = math.exp %22 : vector<2x32xf32>
    %c0_13 = arith.constant 0 : index
    %c0_14 = arith.constant 0 : index
    %24 = vector.load %arg6[%c0_13, %c0_14] : memref<2x32xf32, #tpu.memory_space<vmem>>, vector<2x32xf32>
    %25 = arith.mulf %23, %24 : vector<2x32xf32>
    %26 = arith.addf %21, %25 : vector<2x32xf32>
    %27 = arith.mulf %23, %23 : vector<2x32xf32>
    %28 = arith.mulf %21, %21 : vector<2x32xf32>
    %29 = arith.addf %27, %28 : vector<2x32xf32>
    %30 = arith.subf %29, %22 : vector<2x32xf32>
    %cst_15 = arith.constant 5.000000e-01 : f32
    %31 = vector.broadcast %cst_15 : f32 to vector<2x32xf32>
    %32 = arith.subf %30, %31 : vector<2x32xf32>
    %cst_16 = arith.constant dense<0.000000e+00> : vector<2xf32>
    %33 = vector.multi_reduction <add>, %32, %cst_16 [1] : vector<2x32xf32> to vector<2xf32>
    %34 = vector.shape_cast %33 : vector<2xf32> to vector<2x1xf32>
    %cst_17 = arith.constant 0.000000e+00 : f32
    %35 = vector.broadcast %cst_17 : f32 to vector<2x128xf32>
    %c0_18 = arith.constant 0 : index
    %c0_19 = arith.constant 0 : index
    %36 = vector.load %arg7[%c0_18, %c0_19] : memref<2x128xf32, #tpu.memory_space<vmem>>, vector<2x128xf32>
    tpu.vector_store %arg7[%c0_18, %c0_19], %35 {strides = array<i32>} : memref<2x128xf32, #tpu.memory_space<vmem>>, vector<2x128xf32>,
    %c0_20 = arith.constant 0 : index
    %c0_21 = arith.constant 0 : index
    %37 = vector.load %arg7[%c0_20, %c0_21] : memref<2x128xf32, #tpu.memory_space<vmem>>, vector<2x32xf32>
    tpu.vector_store %arg7[%c0_20, %c0_21], %26 {strides = array<i32>} : memref<2x128xf32, #tpu.memory_space<vmem>>, vector<2x32xf32>,
    %c0_22 = arith.constant 0 : index
    %c32 = arith.constant 32 : index
    %38 = vector.load %arg7[%c0_22, %c32] : memref<2x128xf32, #tpu.memory_space<vmem>>, vector<2x1xf32>
    tpu.vector_store %arg7[%c0_22, %c32], %34 {strides = array<i32>} : memref<2x128xf32, #tpu.memory_space<vmem>>, vector<2x1xf32>,
    return
  }
  func.func @transform_0(%arg0: i32) -> (i32, i32) {
    %c0_i32 = arith.constant 0 : i32
    %c0_i32_0 = arith.constant 0 : i32
    return %arg0, %c0_i32 : i32, i32
  }
  func.func @transform_1(%arg0: i32) -> (i32, i32) {
    %c0_i32 = arith.constant 0 : i32
    %c0_i32_0 = arith.constant 0 : i32
    %c0_i32_1 = arith.constant 0 : i32
    return %c0_i32, %c0_i32_0 : i32, i32
  }
  func.func @transform_2(%arg0: i32) -> (i32, i32) {
    %c0_i32 = arith.constant 0 : i32
    %c0_i32_0 = arith.constant 0 : i32
    %c0_i32_1 = arith.constant 0 : i32
    return %c0_i32, %c0_i32_0 : i32, i32
  }
  func.func @transform_3(%arg0: i32) -> (i32, i32) {
    %c0_i32 = arith.constant 0 : i32
    %c0_i32_0 = arith.constant 0 : i32
    %c0_i32_1 = arith.constant 0 : i32
    return %c0_i32, %c0_i32_0 : i32, i32
  }
  func.func @transform_4(%arg0: i32) -> (i32, i32) {
    %c0_i32 = arith.constant 0 : i32
    %c0_i32_0 = arith.constant 0 : i32
    %c0_i32_1 = arith.constant 0 : i32
    return %c0_i32, %c0_i32_0 : i32, i32
  }
  func.func @transform_5(%arg0: i32) -> (i32, i32) {
    %c0_i32 = arith.constant 0 : i32
    %c0_i32_0 = arith.constant 0 : i32
    return %arg0, %c0_i32 : i32, i32
  }
  func.func @transform_6(%arg0: i32) -> (i32, i32) {
    %c0_i32 = arith.constant 0 : i32
    %c0_i32_0 = arith.constant 0 : i32
    return %arg0, %c0_i32 : i32, i32
  }
}

</mosaic_0001>

<bundles_post_ra>
// kernel: tpu_custom_call.1
= control target key start
LH: loop header
LB: loop body
LE: loop exit
PB: predicated region body
PF: predicated region fallthrough
CT: control target
= control target key end

     0   :  { %11 = vsyncpa [#allocation3], 0  ;;  %s3459_s0 = inlined_call_operand.hbm [shape: f32[2,1024], index: 0, kind: input, shape index: {}]   ;;  %s3460_s1 = inlined_call_operand.hbm [shape: bf16[1024,512], index: 1, kind: input, shape index: {}]   ;;  %s3461_s2 = inlined_call_operand.hbm [shape: f32[1,512], index: 2, kind: input, shape index: {}]   ;;  %s3462_s3 = inlined_call_operand.hbm [shape: bf16[512,128], index: 3, kind: input, shape index: {}]   ;;  %s3463_s4 = inlined_call_operand.vmem [shape: f32[1,128], index: 4, kind: input, shape index: {}]   ;;  %s3464_s5 = inlined_call_operand.vmem [shape: f32[2,32], index: 5, kind: input, shape index: {}]   ;;  %s3465_s6 = inlined_call_operand.hbm [shape: f32[2,128], index: 6, kind: output, shape index: {}]  }
   0x1   :  { %12 = vsyncpa [#allocation6], 0 }
   0x2   :  { %13 = vsyncpa [#allocation9], 0 }
   0x3   :  { %14 = vsyncpa [#allocation4], 0  ;;  %s3325_s21 = smov [#allocation5]  }
   0x4   :  { %s30_s22 = sshll.u32 %s3325_s21, 4  ;;  %s31_s22 = int_to_ptr.vmem [resolvable:$true] %s30_s22 }
   0x5   :  { %s3225_s23 = scalar_lea.vmem %s31_s22, 32768  ;;  %p3230_p1 = scmp.lt.s32.totalorder %s31_s22, %s31_s22 }
   0x6   :  { %p3226_p0 = scmp.ne.s32.totalorder %s31_s22, %s3225_s23  ;;  %p3231_p2 = scmp.lt.s32.totalorder %s3225_s23, %s3225_s23 }
   0x8   :  { %p3232_p3 = por %p3231_p2, %p3230_p1 }
   0xa   :  { %p3233_p4 = pnand %p3232_p3, %p3226_p0 }
   0xc   :  { %3236 = shalt.err (!%p3233_p4)
}
   0xd   :  { %s3326_s24 = smov 256   ;;  %s3327_s25 = smov 16  }
   0xe   :  { %36 = dma.hbm_to_vmem [thread:$0]  %s3460_s1, 32768, %s31_s22, [#allocation6], %s3326_s24, %s3326_s24, %s3327_s25  }
   0xf   :  { %s3328_s28 = smov [#allocation2]   ;;  %s3329_s30 = smov [#allocation7]  }
  0x10   :  { %s21_s29 = sshll.u32 %s3328_s28, 4  ;;  %s43_s7 = sshll.u32 %s3329_s30, 4  ;;  %s22_s29 = int_to_ptr.vmem [resolvable:$true] %s21_s29  ;;  %s44_s7 = int_to_ptr.vmem [resolvable:$true] %s43_s7 }
  0x11   :  { %s3245_s8 = scalar_lea.vmem %s22_s29, 256  ;;  %p3250_p6 = scmp.lt.s32.totalorder %s22_s29, %s22_s29 }
  0x12   :  { %p3246_p5 = scmp.ne.s32.totalorder %s22_s29, %s3245_s8  ;;  %p3251_p7 = scmp.lt.s32.totalorder %s3245_s8, %s3245_s8 }
  0x14   :  { %p3252_p8 = por %p3251_p7, %p3250_p6 }
  0x16   :  { %p3253_p9 = pnand %p3252_p8, %p3246_p5 }
  0x18   :  { %3256 = shalt.err (!%p3253_p9)
}
  0x19   :  { %24 = dma.hbm_to_vmem [thread:$0]  %s3459_s0, 256, %s22_s29, [#allocation3]  }
  0x1a   :  { %s3265_s11 = scalar_lea.vmem %s44_s7, 64  ;;  %p3270_p11 = scmp.lt.s32.totalorder %s44_s7, %s44_s7 }
  0x1b   :  { %p3266_p10 = scmp.ne.s32.totalorder %s44_s7, %s3265_s11  ;;  %p3271_p12 = scmp.lt.s32.totalorder %s3265_s11, %s3265_s11 }
  0x1d   :  { %p3272_p13 = por %p3271_p12, %p3270_p11 }
  0x1f   :  { %p3273_p0 = pnand %p3272_p13, %p3266_p10 }
  0x21   :  { %3276 = shalt.err (!%p3273_p0)
}
  0x22   :  { %46 = dma.hbm_to_vmem [thread:$0]  %s3461_s2, 64, %s44_s7, [#allocation6]  }
  0x23   :  { %s3330_s13 = smov [#allocation8]  }
  0x24   :  { %s52_s14 = sshll.u32 %s3330_s13, 4  ;;  %s53_s14 = int_to_ptr.vmem [resolvable:$true] %s52_s14 }
  0x25   :  { %s3285_s15 = scalar_lea.vmem %s53_s14, 4096  ;;  %p3290_p2 = scmp.lt.s32.totalorder %s53_s14, %s53_s14 }
  0x26   :  { %p3286_p1 = scmp.ne.s32.totalorder %s53_s14, %s3285_s15  ;;  %p3291_p3 = scmp.lt.s32.totalorder %s3285_s15, %s3285_s15 }
  0x28   :  { %p3292_p4 = por %p3291_p3, %p3290_p2 }
  0x2a   :  { %p3293_p5 = pnand %p3292_p4, %p3286_p1 }
  0x2c   :  { %3296 = shalt.err (!%p3293_p5)
}
  0x2d   :  { %s3331_s0 = smov 64   ;;  %s3332_s16 = smov 4  }
  0x2e   :  { %58 = dma.hbm_to_vmem [thread:$0]  %s3462_s3, 4096, %s53_s14, [#allocation9], %s3331_s0, %s3331_s0, %s3332_s16  }
  0x2f   :  { %3317 = dma.done.wait [#allocation3], 256  }
  0x30   :  { %3318 = vsyncadd [#allocation3], 4294967040 }
  0x31   :  { %3319 = dma.done.wait [#allocation6], 32832  }
  0x32   :  { %3320 = vsyncadd [#allocation6], 4294934464 }
  0x33   :  { %3321 = dma.done.wait [#allocation9], 4096  }
  0x34   :  { %3322 = vsyncadd [#allocation9], 4294963200  ;;  %v2789_v0 = vld [vmem:[#allocation5 + $0xe4] ss:$16 sps:$4 sm:$0xff]   ;;  %v2793_v2 = vld [vmem:[#allocation5 + $0xe0] ss:$16 sps:$4 sm:$0xff]   ;;  %v84_v38 = vlaneseq }
  0x35   :  { %v2791_v1 = vld [vmem:[#allocation5 + $0x2e4] ss:$16 sps:$4 sm:$0xff]   ;;  %1688 = vmatprep.subr.bf16.mxu0 %v2789_v0  ;;  %v2794_v3 = vld [vmem:[#allocation5 + $0x2e0] ss:$16 sps:$4 sm:$0xff]   ;;  %v3333_v36 = vmov 1983009808  }
  0x36   :  { %1729 = vmatprep.subr.bf16.mxu1 %v2791_v1  ;;  %v2795_v4 = vld [vmem:[#allocation5 + $0xc4] ss:$16 sps:$4 sm:$0xff]   ;;  %1689 = vmatpush1.bf16.msra.mxu0 %v2793_v2  ;;  %v2799_v6 = vld [vmem:[#allocation5 + $0xc0] ss:$16 sps:$4 sm:$0xff]   ;;  %v82_v37 = vunpack.c.l.s4 %v3333_v36  ;;  %v3385_v43 = vshrl.u32 %v84_v38, 7  ;;  %s3334_s19 = smov 32  }
  0x37   :  { %1730 = vmatpush1.bf16.msra.mxu1 %v2794_v3  ;;  %v2797_v5 = vld [vmem:[#allocation5 + $0x2c4] ss:$16 sps:$4 sm:$0xff]   ;;  %1690 = vmatprep.subr.bf16.mxu0 %v2795_v4  ;;  %v2800_v7 = vld [vmem:[#allocation5 + $0x2c0] ss:$16 sps:$4 sm:$0xff]   ;;  %vm2413_vm4 = vcmask 254976   ;;  %s3337_s21 = smov [#allocation10]  }
  0x38   :  { %1731 = vmatprep.subr.bf16.mxu1 %v2797_v5  ;;  %v2801_v8 = vld [vmem:[#allocation5 + $0xa4] ss:$16 sps:$4 sm:$0xff]   ;;  %v2805_v10 = vld [vmem:[#allocation5 + $0xa0] ss:$16 sps:$4 sm:$0xff]   ;;  %v83_v42 = vunpack.c.0.s8 %v82_v37  ;;  %s2427_s22 = sshll.u32 %s3337_s21, 4  ;;  %vm2419_vm5 = vcmask 263424   ;;  %s2428_s22 = int_to_ptr.vmem [resolvable:$true] %s2427_s22 }
  0x39   :  { %v2803_v9 = vld [vmem:[#allocation5 + $0x2a4] ss:$16 sps:$4 sm:$0xff]   ;;  %v2806_v11 = vld [vmem:[#allocation5 + $0x2a0] ss:$16 sps:$4 sm:$0xff]   ;;  %s3297_s23 = scalar_lea.vmem %s2428_s22, 32  ;;  %p3302_p7 = scmp.lt.s32.totalorder %s2428_s22, %s2428_s22 }
  0x3a   :  { %1691 = vmatpush1.bf16.msra.mxu0 %v2799_v6  ;;  %v2807_v12 = vld [vmem:[#allocation5 + $0x84] ss:$16 sps:$4 sm:$0xff]   ;;  %v2811_v14 = vld [vmem:[#allocation5 + $0x80] ss:$16 sps:$4 sm:$0xff]   ;;  %v3388_v49 = vsub.s32 %v83_v42, %v3385_v43  ;;  %v77_v42 = vld [vmem:[#allocation2 + $0x8] sm:$0xff]  ;;  %p3298_p6 = scmp.ne.s32.totalorder %s2428_s22, %s3297_s23  ;;  %p3303_p8 = scmp.lt.s32.totalorder %s3297_s23, %s3297_s23 }
  0x3b   :  { %1732 = vmatpush1.bf16.msra.mxu1 %v2800_v7  ;;  %1692 = vmatprep.subr.bf16.mxu0 %v2801_v8  ;;  %v2809_v13 = vld [vmem:[#allocation5 + $0x284] ss:$16 sps:$4 sm:$0xff]   ;;  %v2812_v15 = vld [vmem:[#allocation5 + $0x280] ss:$16 sps:$4 sm:$0xff]  }
  0x3c   :  { %1733 = vmatprep.subr.bf16.mxu1 %v2803_v9  ;;  %v2813_v16 = vld [vmem:[#allocation5 + $0x64] ss:$16 sps:$4 sm:$0xff]   ;;  %v2817_v18 = vld [vmem:[#allocation5 + $0x60] ss:$16 sps:$4 sm:$0xff]   ;;  %p3304_p9 = por %p3303_p8, %p3302_p7 }
  0x3d   :  { %v2815_v17 = vld [vmem:[#allocation5 + $0x264] ss:$16 sps:$4 sm:$0xff]   ;;  %v2818_v19 = vld [vmem:[#allocation5 + $0x260] ss:$16 sps:$4 sm:$0xff]  }
  0x3e   :  { %1693 = vmatpush1.bf16.msra.mxu0 %v2805_v10  ;;  %v2819_v20 = vld [vmem:[#allocation5 + $0x44] ss:$16 sps:$4 sm:$0xff]   ;;  %v2823_v22 = vld [vmem:[#allocation5 + $0x40] ss:$16 sps:$4 sm:$0xff]   ;;  %p3305_p10 = pnand %p3304_p9, %p3298_p6 }
  0x3f   :  { %1734 = vmatpush1.bf16.msra.mxu1 %v2806_v11  ;;  %1694 = vmatprep.subr.bf16.mxu0 %v2807_v12  ;;  %v2821_v21 = vld [vmem:[#allocation5 + $0x244] ss:$16 sps:$4 sm:$0xff]   ;;  %v2824_v23 = vld [vmem:[#allocation5 + $0x240] ss:$16 sps:$4 sm:$0xff]  }
  0x40   :  { %1735 = vmatprep.subr.bf16.mxu1 %v2809_v13  ;;  %v2825_v24 = vld [vmem:[#allocation5 + $0x24] ss:$16 sps:$4 sm:$0xff]   ;;  %v2829_v26 = vld [vmem:[#allocation5 + $0x20] ss:$16 sps:$4 sm:$0xff]  }
  0x41   :  { %v2827_v25 = vld [vmem:[#allocation5 + $0x224] ss:$16 sps:$4 sm:$0xff]   ;;  %v2830_v27 = vld [vmem:[#allocation5 + $0x220] ss:$16 sps:$4 sm:$0xff]  }
  0x42   :  { %1695 = vmatpush1.bf16.msra.mxu0 %v2811_v14  ;;  %v2831_v28 = vld [vmem:[#allocation5 + $0x4] ss:$16 sps:$4 sm:$0xff]   ;;  %v2835_v30 = vld [vmem:[#allocation5] ss:$16 sps:$4 sm:$0xff]  }
  0x43   :  { %1736 = vmatpush1.bf16.msra.mxu1 %v2812_v15  ;;  %1696 = vmatprep.subr.bf16.mxu0 %v2813_v16  ;;  %v2833_v29 = vld [vmem:[#allocation5 + $0x204] ss:$16 sps:$4 sm:$0xff]   ;;  %v2836_v31 = vld [vmem:[#allocation5 + $0x200] ss:$16 sps:$4 sm:$0xff]  }
  0x44   :  { %1737 = vmatprep.subr.bf16.mxu1 %v2815_v17  ;;  %v2837_v32 = vld [vmem:[#allocation5 + $0x1e4] ss:$16 sps:$4 sm:$0xff]   ;;  %v2841_v34 = vld [vmem:[#allocation5 + $0x1e0] ss:$16 sps:$4 sm:$0xff]  }
  0x45   :  { %v2839_v33 = vld [vmem:[#allocation5 + $0x3e4] ss:$16 sps:$4 sm:$0xff]   ;;  %v2842_v35 = vld [vmem:[#allocation5 + $0x3e0] ss:$16 sps:$4 sm:$0xff]  }
  0x46   :  { %1697 = vmatpush1.bf16.msra.mxu0 %v2817_v18  ;;  %v2843_v39 = vld [vmem:[#allocation5 + $0x1c4] ss:$16 sps:$4 sm:$0xff]   ;;  %v2847_v41 = vld [vmem:[#allocation5 + $0x1c0] ss:$16 sps:$4 sm:$0xff]  }
  0x47   :  { %1738 = vmatpush1.bf16.msra.mxu1 %v2818_v19  ;;  %1698 = vmatprep.subr.bf16.mxu0 %v2819_v20  ;;  %v2845_v40 = vld [vmem:[#allocation5 + $0x3c4] ss:$16 sps:$4 sm:$0xff]   ;;  %v2848_v44 = vld [vmem:[#allocation5 + $0x3c0] ss:$16 sps:$4 sm:$0xff]  }
  0x48   :  { %1739 = vmatprep.subr.bf16.mxu1 %v2821_v21  ;;  %v2849_v45 = vld [vmem:[#allocation5 + $0x1a4] ss:$16 sps:$4 sm:$0xff]   ;;  %v2853_v47 = vld [vmem:[#allocation5 + $0x1a0] ss:$16 sps:$4 sm:$0xff]  }
  0x49   :  { %v2851_v46 = vld [vmem:[#allocation5 + $0x3a4] ss:$16 sps:$4 sm:$0xff]   ;;  %v2854_v48 = vld [vmem:[#allocation5 + $0x3a0] ss:$16 sps:$4 sm:$0xff]  }
  0x4a   :  { %1699 = vmatpush1.bf16.msra.mxu0 %v2823_v22  ;;  %v2855_v50 = vld [vmem:[#allocation5 + $0x184] ss:$16 sps:$4 sm:$0xff]   ;;  %v2859_v53 = vld [vmem:[#allocation5 + $0x180] ss:$16 sps:$4 sm:$0xff]  }
  0x4b   :  { %1740 = vmatpush1.bf16.msra.mxu1 %v2824_v23  ;;  %1700 = vmatprep.subr.bf16.mxu0 %v2825_v24  ;;  %v2857_v51 = vld [vmem:[#allocation5 + $0x384] ss:$16 sps:$4 sm:$0xff]   ;;  %v2860_v56 = vld [vmem:[#allocation5 + $0x380] ss:$16 sps:$4 sm:$0xff]  }
  0x4c   :  { %1741 = vmatprep.subr.bf16.mxu1 %v2827_v25  ;;  %v76_v52 = vld [vmem:[#allocation2] sm:$0xff] }
  0x4d   :  { %v87_v54 = vrot.slane %v76_v52, %v3388_v49  ;;  %v80_v55 = vcombine.high %v76_v52, %v76_v52  ;;  %v2861_v57 = vld [vmem:[#allocation5 + $0x164] ss:$16 sps:$4 sm:$0xff]   ;;  %v2865_v61 = vld [vmem:[#allocation5 + $0x160] ss:$16 sps:$4 sm:$0xff]  }
  0x4e   :  { %1701 = vmatpush1.bf16.msra.mxu0 %v2829_v26  ;;  %v2863_v58 = vld [vmem:[#allocation5 + $0x364] ss:$16 sps:$4 sm:$0xff]   ;;  %v2866_v0 = vld [vmem:[#allocation5 + $0x360] ss:$16 sps:$4 sm:$0xff]  }
  0x4f   :  { %1742 = vmatpush1.bf16.msra.mxu1 %v2830_v27  ;;  %1702 = vmatprep.subr.bf16.mxu0 %v2831_v28  ;;  %v95_v59 = vcombine.high %v87_v54, %v87_v54  ;;  %v94_v60 = vrot.slane %v80_v55, %v3388_v49  ;;  %v2867_v1 = vld [vmem:[#allocation5 + $0x144] ss:$16 sps:$4 sm:$0xff]   ;;  %v2871_v4 = vld [vmem:[#allocation5 + $0x140] ss:$16 sps:$4 sm:$0xff]   ;;  %v3398_v16 = vpack.c.bf16 %v87_v54, %v87_v54 }
  0x50   :  { %1743 = vmatprep.subr.bf16.mxu1 %v2833_v29  ;;  %v2869_v2 = vld [vmem:[#allocation5 + $0x344] ss:$16 sps:$4 sm:$0xff]   ;;  %v2872_v5 = vld [vmem:[#allocation5 + $0x340] ss:$16 sps:$4 sm:$0xff]  }
  0x51   :  { %v3392_v62 = vpack.c.bf16 %v95_v59, %v95_v59  ;;  %v96_v63 = vcombine.high %v94_v60, %v94_v60  ;;  %v2873_v6 = vld [vmem:[#allocation5 + $0x124] ss:$16 sps:$4 sm:$0xff]   ;;  %v2877_v8 = vld [vmem:[#allocation5 + $0x120] ss:$16 sps:$4 sm:$0xff]   ;;  %v3400_v17 = vpack.c.bf16 %v94_v60, %v94_v60 }
  0x52   :  { %1703 = vmatpush1.bf16.msra.mxu0 %v2835_v30  ;;  %v2875_v7 = vld [vmem:[#allocation5 + $0x324] ss:$16 sps:$4 sm:$0xff]   ;;  %v2878_v9 = vld [vmem:[#allocation5 + $0x320] ss:$16 sps:$4 sm:$0xff]  }
  0x53   :  { %1744 = vmatpush1.bf16.msra.mxu1 %v2836_v31  ;;  %1704 = vmatprep.subr.bf16.mxu0 %v2837_v32  ;;  %v3394_v3 = vpack.c.bf16 %v96_v63, %v96_v63  ;;  %v2879_v10 = vld [vmem:[#allocation5 + $0x104] ss:$16 sps:$4 sm:$0xff]   ;;  %v2883_v12 = vld [vmem:[#allocation5 + $0x100] ss:$16 sps:$4 sm:$0xff]  }
  0x54   :  { %1745 = vmatprep.subr.bf16.mxu1 %v2839_v33  ;;  %1720 = vmatprep.mubr.bf16.mxu0 %v3392_v62  ;;  %v2881_v11 = vld [vmem:[#allocation5 + $0x304] ss:$16 sps:$4 sm:$0xff]   ;;  %v2884_v13 = vld [vmem:[#allocation5 + $0x300] ss:$16 sps:$4 sm:$0xff]  }
  0x55   :  { %1761 = vmatprep.mubr.bf16.mxu1 %v3394_v3  ;;  %v2888_v14 = vld [vmem:[#allocation5 + $0x4e4] ss:$16 sps:$4 sm:$0xff]   ;;  %v2886_v18 = vld [vmem:[#allocation5 + $0x4e0] ss:$16 sps:$4 sm:$0xff]  }
  0x56   :  { %1705 = vmatpush2.bf16.msra.mxu0 %v2841_v34  ;;  %v2891_v15 = vld [vmem:[#allocation5 + $0x6e4] ss:$16 sps:$4 sm:$0xff]   ;;  %v2889_v19 = vld [vmem:[#allocation5 + $0x6e0] ss:$16 sps:$4 sm:$0xff]  }
  0x57   :  { %1746 = vmatpush2.bf16.msra.mxu1 %v2842_v35  ;;  %1706 = vmatprep.subr.bf16.mxu0 %v2843_v39  ;;  %v2894_v20 = vld [vmem:[#allocation5 + $0x4c4] ss:$16 sps:$4 sm:$0xff]   ;;  %v2892_v22 = vld [vmem:[#allocation5 + $0x4c0] ss:$16 sps:$4 sm:$0xff]  }
  0x58   :  { %1747 = vmatprep.subr.bf16.mxu1 %v2845_v40  ;;  %v2897_v21 = vld [vmem:[#allocation5 + $0x6c4] ss:$16 sps:$4 sm:$0xff]   ;;  %v2895_v23 = vld [vmem:[#allocation5 + $0x6c0] ss:$16 sps:$4 sm:$0xff]  }
  0x59   :  { %v2900_v24 = vld [vmem:[#allocation5 + $0x4a4] ss:$16 sps:$4 sm:$0xff]   ;;  %v2898_v26 = vld [vmem:[#allocation5 + $0x4a0] ss:$16 sps:$4 sm:$0xff]  }
  0x5a   :  { %1707 = vmatpush2.bf16.msra.mxu0 %v2847_v41  ;;  %v2903_v25 = vld [vmem:[#allocation5 + $0x6a4] ss:$16 sps:$4 sm:$0xff]   ;;  %v2901_v27 = vld [vmem:[#allocation5 + $0x6a0] ss:$16 sps:$4 sm:$0xff]  }
  0x5b   :  { %1748 = vmatpush2.bf16.msra.mxu1 %v2848_v44  ;;  %1708 = vmatprep.subr.bf16.mxu0 %v2849_v45  ;;  %v2906_v28 = vld [vmem:[#allocation5 + $0x484] ss:$16 sps:$4 sm:$0xff]   ;;  %v2904_v30 = vld [vmem:[#allocation5 + $0x480] ss:$16 sps:$4 sm:$0xff]   ;;  %v3405_v44 = vrot.slane %v77_v42, %v3388_v49  ;;  %v97_v45 = vcombine.high %v77_v42, %v77_v42  ;;  %v2998_v42 = vld [vmem:[#allocation5 + $0x2a8] ss:$16 sps:$4 sm:$0xff]  }
  0x5c   :  { %1749 = vmatprep.subr.bf16.mxu1 %v2851_v46  ;;  %v2909_v29 = vld [vmem:[#allocation5 + $0x684] ss:$16 sps:$4 sm:$0xff]   ;;  %v2907_v31 = vld [vmem:[#allocation5 + $0x680] ss:$16 sps:$4 sm:$0xff]  }
  0x5d   :  { %v2912_v32 = vld [vmem:[#allocation5 + $0x464] ss:$16 sps:$4 sm:$0xff]   ;;  %v2910_v34 = vld [vmem:[#allocation5 + $0x460] ss:$16 sps:$4 sm:$0xff]  }
  0x5e   :  { %1709 = vmatpush2.bf16.msra.mxu0 %v2853_v47  ;;  %v2915_v33 = vld [vmem:[#allocation5 + $0x664] ss:$16 sps:$4 sm:$0xff]   ;;  %v2913_v35 = vld [vmem:[#allocation5 + $0x660] ss:$16 sps:$4 sm:$0xff]  }
  0x5f   :  { %1750 = vmatpush2.bf16.msra.mxu1 %v2854_v48  ;;  %1710 = vmatprep.subr.bf16.mxu0 %v2855_v50  ;;  %v2918_v36 = vld [vmem:[#allocation5 + $0x444] ss:$16 sps:$4 sm:$0xff]   ;;  %v2916_v38 = vld [vmem:[#allocation5 + $0x440] ss:$16 sps:$4 sm:$0xff]   ;;  %v112_v48 = vcombine.high %v3405_v44, %v3405_v44  ;;  %v3410_v50 = vrot.slane %v97_v45, %v3388_v49  ;;  %v3006_v45 = vld [vmem:[#allocation5 + $0x28c] ss:$16 sps:$4 sm:$0xff]  }
  0x60   :  { %1751 = vmatprep.subr.bf16.mxu1 %v2857_v51  ;;  %v2921_v37 = vld [vmem:[#allocation5 + $0x644] ss:$16 sps:$4 sm:$0xff]   ;;  %v2919_v39 = vld [vmem:[#allocation5 + $0x640] ss:$16 sps:$4 sm:$0xff]  }
  0x61   :  { %v2924_v40 = vld [vmem:[#allocation5 + $0x424] ss:$16 sps:$4 sm:$0xff]   ;;  %v2922_v46 = vld [vmem:[#allocation5 + $0x420] ss:$16 sps:$4 sm:$0xff]   ;;  %v113_v54 = vcombine.high %v3410_v50, %v3410_v50 }
  0x62   :  { %1711 = vmatpush2.bf16.msra.mxu0 %v2859_v53  ;;  %v2927_v41 = vld [vmem:[#allocation5 + $0x624] ss:$16 sps:$4 sm:$0xff]   ;;  %v2925_v47 = vld [vmem:[#allocation5 + $0x620] ss:$16 sps:$4 sm:$0xff]   ;;  %v3412_v53 = vpack.c.bf16 %v112_v48, %v112_v48  ;;  %v3009_v48 = vld [vmem:[#allocation5 + $0x6c] ss:$16 sps:$4 sm:$0xff]  }
  0x63   :  { %1752 = vmatpush2.bf16.msra.mxu1 %v2860_v56  ;;  %1712 = vmatprep.subr.bf16.mxu0 %v2861_v57  ;;  %v2930_v51 = vld [vmem:[#allocation5 + $0x404] ss:$16 sps:$4 sm:$0xff]   ;;  %v2928_v55 = vld [vmem:[#allocation5 + $0x400] ss:$16 sps:$4 sm:$0xff]   ;;  %v3416_v57 = vpack.c.bf16 %v113_v54, %v113_v54  ;;  %v3013_v54 = vld [vmem:[#allocation5 + $0x48] ss:$16 sps:$4 sm:$0xff]  }
  0x64   :  { %1753 = vmatprep.subr.bf16.mxu1 %v2863_v58  ;;  %v2933_v52 = vld [vmem:[#allocation5 + $0x604] ss:$16 sps:$4 sm:$0xff]   ;;  %v2931_v56 = vld [vmem:[#allocation5 + $0x600] ss:$16 sps:$4 sm:$0xff]  }
  0x65   :  { %v2936_v58 = vld [vmem:[#allocation5 + $0x5e4] ss:$16 sps:$4 sm:$0xff]   ;;  %v2934_v59 = vld [vmem:[#allocation5 + $0x5e0] ss:$16 sps:$4 sm:$0xff]  }
  0x66   :  { %1713 = vmatpush2.bf16.msra.mxu0 %v2865_v61  ;;  %v2939_v49 = vld [vmem:[#allocation5 + $0x7e4] ss:$16 sps:$4 sm:$0xff]   ;;  %v2937_v60 = vld [vmem:[#allocation5 + $0x7e0] ss:$16 sps:$4 sm:$0xff]  }
  0x67   :  { %1754 = vmatpush2.bf16.msra.mxu1 %v2866_v0  ;;  %1714 = vmatprep.subr.bf16.mxu0 %v2867_v1  ;;  %v2942_v61 = vld [vmem:[#allocation5 + $0x5c4] ss:$16 sps:$4 sm:$0xff]   ;;  %v2940_v0 = vld [vmem:[#allocation5 + $0x5c0] ss:$16 sps:$4 sm:$0xff]  }
  0x68   :  { %1755 = vmatprep.subr.bf16.mxu1 %v2869_v2  ;;  %v2945_v63 = vld [vmem:[#allocation5 + $0x7c4] ss:$16 sps:$4 sm:$0xff]   ;;  %v2943_v1 = vld [vmem:[#allocation5 + $0x7c0] ss:$16 sps:$4 sm:$0xff]  }
  0x69   :  { %v2948_v2 = vld [vmem:[#allocation5 + $0x5a4] ss:$16 sps:$4 sm:$0xff]  }
  0x6a   :  { %1715 = vmatpush2.bf16.msra.mxu0 %v2871_v4  ;;  %v2951_v4 = vld [vmem:[#allocation5 + $0x7a4] ss:$16 sps:$4 sm:$0xff]  }
  0x6b   :  { %1756 = vmatpush2.bf16.msra.mxu1 %v2872_v5  ;;  %1716 = vmatprep.subr.bf16.mxu0 %v2873_v6  ;;  %v2946_v5 = vld [vmem:[#allocation5 + $0x5a0] ss:$16 sps:$4 sm:$0xff]  }
  0x6c   :  { %1757 = vmatprep.subr.bf16.mxu1 %v2875_v7  ;;  %v2949_v6 = vld [vmem:[#allocation5 + $0x7a0] ss:$16 sps:$4 sm:$0xff]   ;;  %v2954_v7 = vld [vmem:[#allocation5 + $0x584] ss:$16 sps:$4 sm:$0xff]  }
  0x6e   :  { %1717 = vmatpush2.bf16.msra.mxu0 %v2877_v8  ;;  %v2957_v8 = vld [vmem:[#allocation5 + $0x784] ss:$16 sps:$4 sm:$0xff]  }
  0x6f   :  { %1758 = vmatpush2.bf16.msra.mxu1 %v2878_v9  ;;  %1718 = vmatprep.subr.bf16.mxu0 %v2879_v10  ;;  %v2952_v9 = vld [vmem:[#allocation5 + $0x580] ss:$16 sps:$4 sm:$0xff]  }
  0x70   :  { %1759 = vmatprep.subr.bf16.mxu1 %v2881_v11  ;;  %v2955_v10 = vld [vmem:[#allocation5 + $0x780] ss:$16 sps:$4 sm:$0xff]   ;;  %v2960_v11 = vld [vmem:[#allocation5 + $0x564] ss:$16 sps:$4 sm:$0xff]  }
  0x72   :  { %1719 = vmatpush2.bf16.msra.mxu0 %v2883_v12  ;;  %v2963_v12 = vld [vmem:[#allocation5 + $0x764] ss:$16 sps:$4 sm:$0xff]  }
  0x73   :  { %1760 = vmatpush2.bf16.msra.mxu1 %v2884_v13  ;;  %1770 = vmatprep.subr.bf16.mxu0 %v2888_v14  ;;  %v2958_v13 = vld [vmem:[#allocation5 + $0x560] ss:$16 sps:$4 sm:$0xff]  }
  0x74   :  { %1811 = vmatprep.subr.bf16.mxu1 %v2891_v15  ;;  %v2961_v14 = vld [vmem:[#allocation5 + $0x760] ss:$16 sps:$4 sm:$0xff]   ;;  %v2966_v15 = vld [vmem:[#allocation5 + $0x544] ss:$16 sps:$4 sm:$0xff]  }
  0x75   :  { %1721 = vmatmul.mubr.bf16.vlgmr.msra.gmra.mxu0 %v3398_v16 }
  0x76   :  { %1762 = vmatmul.mubr.bf16.vlgmr.msra.gmra.mxu1 %v3400_v17  ;;  %1771 = vmatpush1.bf16.msra.mxu0 %v2886_v18  ;;  %v2969_v18 = vld [vmem:[#allocation5 + $0x744] ss:$16 sps:$4 sm:$0xff]  }
  0x77   :  { %1812 = vmatpush1.bf16.msra.mxu1 %v2889_v19  ;;  %1772 = vmatprep.subr.bf16.mxu0 %v2894_v20  ;;  %v2964_v19 = vld [vmem:[#allocation5 + $0x540] ss:$16 sps:$4 sm:$0xff]  }
  0x78   :  { %1813 = vmatprep.subr.bf16.mxu1 %v2897_v21  ;;  %1802 = vmatprep.mubr.bf16.mxu0 %v3412_v53  ;;  %v2967_v20 = vld [vmem:[#allocation5 + $0x740] ss:$16 sps:$4 sm:$0xff]   ;;  %v2972_v21 = vld [vmem:[#allocation5 + $0x524] ss:$16 sps:$4 sm:$0xff]  }
  0x79   :  { %1843 = vmatprep.mubr.bf16.mxu1 %v3416_v57 }
  0x7a   :  { %1773 = vmatpush1.bf16.msra.mxu0 %v2892_v22  ;;  %v2975_v22 = vld [vmem:[#allocation5 + $0x724] ss:$16 sps:$4 sm:$0xff]  }
  0x7b   :  { %1814 = vmatpush1.bf16.msra.mxu1 %v2895_v23  ;;  %1774 = vmatprep.subr.bf16.mxu0 %v2900_v24  ;;  %v2970_v23 = vld [vmem:[#allocation5 + $0x520] ss:$16 sps:$4 sm:$0xff]  }
  0x7c   :  { %1815 = vmatprep.subr.bf16.mxu1 %v2903_v25  ;;  %v2973_v24 = vld [vmem:[#allocation5 + $0x720] ss:$16 sps:$4 sm:$0xff]   ;;  %v2978_v25 = vld [vmem:[#allocation5 + $0x504] ss:$16 sps:$4 sm:$0xff]  }
  0x7e   :  { %1775 = vmatpush1.bf16.msra.mxu0 %v2898_v26  ;;  %v2981_v26 = vld [vmem:[#allocation5 + $0x704] ss:$16 sps:$4 sm:$0xff]  }
  0x7f   :  { %1816 = vmatpush1.bf16.msra.mxu1 %v2901_v27  ;;  %1776 = vmatprep.subr.bf16.mxu0 %v2906_v28  ;;  %v2976_v27 = vld [vmem:[#allocation5 + $0x500] ss:$16 sps:$4 sm:$0xff]  }
  0x80   :  { %1817 = vmatprep.subr.bf16.mxu1 %v2909_v29  ;;  %v2979_v28 = vld [vmem:[#allocation5 + $0x700] ss:$16 sps:$4 sm:$0xff]   ;;  %v2985_v29 = vld [vmem:[#allocation5 + $0xec] ss:$16 sps:$4 sm:$0xff]  }
  0x82   :  { %1777 = vmatpush1.bf16.msra.mxu0 %v2904_v30  ;;  %v2988_v30 = vld [vmem:[#allocation5 + $0x2ec] ss:$16 sps:$4 sm:$0xff]  }
  0x83   :  { %1818 = vmatpush1.bf16.msra.mxu1 %v2907_v31  ;;  %1778 = vmatprep.subr.bf16.mxu0 %v2912_v32  ;;  %v3422_v31 = vpack.c.bf16 %v3405_v44, %v3405_v44  ;;  %v3426_v32 = vpack.c.bf16 %v3410_v50, %v3410_v50  ;;  %v3003_v44 = vld [vmem:[#allocation5 + $0x8c] ss:$16 sps:$4 sm:$0xff]  }
  0x84   :  { %1819 = vmatprep.subr.bf16.mxu1 %v2915_v33  ;;  %v2983_v33 = vld [vmem:[#allocation5 + $0xe8] ss:$16 sps:$4 sm:$0xff]   ;;  %v3012_v50 = vld [vmem:[#allocation5 + $0x26c] ss:$16 sps:$4 sm:$0xff]  }
  0x86   :  { %1779 = vmatpush1.bf16.msra.mxu0 %v2910_v34  ;;  %v2986_v34 = vld [vmem:[#allocation5 + $0x2e8] ss:$16 sps:$4 sm:$0xff]  }
  0x87   :  { %1820 = vmatpush1.bf16.msra.mxu1 %v2913_v35  ;;  %1780 = vmatprep.subr.bf16.mxu0 %v2918_v36  ;;  %v2991_v35 = vld [vmem:[#allocation5 + $0xcc] ss:$16 sps:$4 sm:$0xff]  }
  0x88   :  { %1821 = vmatprep.subr.bf16.mxu1 %v2921_v37  ;;  %v2994_v36 = vld [vmem:[#allocation5 + $0x2cc] ss:$16 sps:$4 sm:$0xff]   ;;  %v2989_v37 = vld [vmem:[#allocation5 + $0xc8] ss:$16 sps:$4 sm:$0xff]  }
  0x8a   :  { %1781 = vmatpush1.bf16.msra.mxu0 %v2916_v38  ;;  %v2992_v38 = vld [vmem:[#allocation5 + $0x2c8] ss:$16 sps:$4 sm:$0xff]  }
  0x8b   :  { %1822 = vmatpush1.bf16.msra.mxu1 %v2919_v39  ;;  %1782 = vmatprep.subr.bf16.mxu0 %v2924_v40  ;;  %v2997_v39 = vld [vmem:[#allocation5 + $0xac] ss:$16 sps:$4 sm:$0xff]  }
  0x8c   :  { %1823 = vmatprep.subr.bf16.mxu1 %v2927_v41  ;;  %v3000_v40 = vld [vmem:[#allocation5 + $0x2ac] ss:$16 sps:$4 sm:$0xff]   ;;  %v2995_v41 = vld [vmem:[#allocation5 + $0xa8] ss:$16 sps:$4 sm:$0xff]  }
  0x8e   :  { %1783 = vmatpush1.bf16.msra.mxu0 %v2922_v46  ;;  %v3001_v46 = vld [vmem:[#allocation5 + $0x88] ss:$16 sps:$4 sm:$0xff]  }
  0x8f   :  { %1824 = vmatpush1.bf16.msra.mxu1 %v2925_v47  ;;  %1784 = vmatprep.subr.bf16.mxu0 %v2930_v51  ;;  %v3004_v47 = vld [vmem:[#allocation5 + $0x288] ss:$16 sps:$4 sm:$0xff]   ;;  %v3015_v51 = vld [vmem:[#allocation5 + $0x4c] ss:$16 sps:$4 sm:$0xff]  }
  0x90   :  { %1825 = vmatprep.subr.bf16.mxu1 %v2933_v52  ;;  %v3018_v52 = vld [vmem:[#allocation5 + $0x24c] ss:$16 sps:$4 sm:$0xff]  }
  0x92   :  { %1785 = vmatpush1.bf16.msra.mxu0 %v2928_v55  ;;  %v3016_v55 = vld [vmem:[#allocation5 + $0x248] ss:$16 sps:$4 sm:$0xff]  }
  0x93   :  { %1826 = vmatpush1.bf16.msra.mxu1 %v2931_v56  ;;  %1786 = vmatprep.subr.bf16.mxu0 %v2936_v58  ;;  %v3021_v56 = vld [vmem:[#allocation5 + $0x2c] ss:$16 sps:$4 sm:$0xff]  }
  0x94   :  { %1827 = vmatprep.subr.bf16.mxu1 %v2939_v49  ;;  %v3024_v58 = vld [vmem:[#allocation5 + $0x22c] ss:$16 sps:$4 sm:$0xff]   ;;  %v3019_v49 = vld [vmem:[#allocation5 + $0x28] ss:$16 sps:$4 sm:$0xff]  }
  0x96   :  { %1787 = vmatpush2.bf16.msra.mxu0 %v2934_v59  ;;  %v3022_v59 = vld [vmem:[#allocation5 + $0x228] ss:$16 sps:$4 sm:$0xff]  }
  0x97   :  { %1828 = vmatpush2.bf16.msra.mxu1 %v2937_v60  ;;  %1788 = vmatprep.subr.bf16.mxu0 %v2942_v61  ;;  %v3027_v60 = vld [vmem:[#allocation5 + $0xc] ss:$16 sps:$4 sm:$0xff]  }
  0x98   :  { %1829 = vmatprep.subr.bf16.mxu1 %v2945_v63  ;;  %v3030_v61 = vld [vmem:[#allocation5 + $0x20c] ss:$16 sps:$4 sm:$0xff]   ;;  %v3025_v63 = vld [vmem:[#allocation5 + $0x8] ss:$16 sps:$4 sm:$0xff]  }
  0x9a   :  { %1789 = vmatpush2.bf16.msra.mxu0 %v2940_v0  ;;  %v3028_v0 = vld [vmem:[#allocation5 + $0x208] ss:$16 sps:$4 sm:$0xff]  }
  0x9b   :  { %1830 = vmatpush2.bf16.msra.mxu1 %v2943_v1  ;;  %1790 = vmatprep.subr.bf16.mxu0 %v2948_v2  ;;  %v3033_v1 = vld [vmem:[#allocation5 + $0x1ec] ss:$16 sps:$4 sm:$0xff]  }
  0x9c   :  { %1831 = vmatprep.subr.bf16.mxu1 %v2951_v4  ;;  %v3036_v2 = vld [vmem:[#allocation5 + $0x3ec] ss:$16 sps:$4 sm:$0xff]   ;;  %v3031_v4 = vld [vmem:[#allocation5 + $0x1e8] ss:$16 sps:$4 sm:$0xff]  }
  0x9e   :  { %1791 = vmatpush2.bf16.msra.mxu0 %v2946_v5  ;;  %v3034_v5 = vld [vmem:[#allocation5 + $0x3e8] ss:$16 sps:$4 sm:$0xff]  }
  0x9f   :  { %1832 = vmatpush2.bf16.msra.mxu1 %v2949_v6  ;;  %1792 = vmatprep.subr.bf16.mxu0 %v2954_v7  ;;  %v3039_v6 = vld [vmem:[#allocation5 + $0x1cc] ss:$16 sps:$4 sm:$0xff]  }
  0xa0   :  { %1833 = vmatprep.subr.bf16.mxu1 %v2957_v8  ;;  %v3042_v7 = vld [vmem:[#allocation5 + $0x3cc] ss:$16 sps:$4 sm:$0xff]   ;;  %v3037_v8 = vld [vmem:[#allocation5 + $0x1c8] ss:$16 sps:$4 sm:$0xff]  }
  0xa2   :  { %1793 = vmatpush2.bf16.msra.mxu0 %v2952_v9  ;;  %v3040_v9 = vld [vmem:[#allocation5 + $0x3c8] ss:$16 sps:$4 sm:$0xff]  }
  0xa3   :  { %1834 = vmatpush2.bf16.msra.mxu1 %v2955_v10  ;;  %1794 = vmatprep.subr.bf16.mxu0 %v2960_v11  ;;  %v3045_v10 = vld [vmem:[#allocation5 + $0x1ac] ss:$16 sps:$4 sm:$0xff]  }
  0xa4   :  { %1835 = vmatprep.subr.bf16.mxu1 %v2963_v12  ;;  %v3048_v11 = vld [vmem:[#allocation5 + $0x3ac] ss:$16 sps:$4 sm:$0xff]   ;;  %v3043_v12 = vld [vmem:[#allocation5 + $0x1a8] ss:$16 sps:$4 sm:$0xff]  }
  0xa6   :  { %1795 = vmatpush2.bf16.msra.mxu0 %v2958_v13  ;;  %v3046_v13 = vld [vmem:[#allocation5 + $0x3a8] ss:$16 sps:$4 sm:$0xff]  }
  0xa7   :  { %1836 = vmatpush2.bf16.msra.mxu1 %v2961_v14  ;;  %1796 = vmatprep.subr.bf16.mxu0 %v2966_v15  ;;  %v3051_v14 = vld [vmem:[#allocation5 + $0x18c] ss:$16 sps:$4 sm:$0xff]  }
  0xa8   :  { %1837 = vmatprep.subr.bf16.mxu1 %v2969_v18  ;;  %v3054_v15 = vld [vmem:[#allocation5 + $0x38c] ss:$16 sps:$4 sm:$0xff]   ;;  %v3049_v18 = vld [vmem:[#allocation5 + $0x188] ss:$16 sps:$4 sm:$0xff]  }
  0xaa   :  { %1797 = vmatpush2.bf16.msra.mxu0 %v2964_v19  ;;  %v3052_v19 = vld [vmem:[#allocation5 + $0x388] ss:$16 sps:$4 sm:$0xff]  }
  0xab   :  { %1838 = vmatpush2.bf16.msra.mxu1 %v2967_v20  ;;  %1798 = vmatprep.subr.bf16.mxu0 %v2972_v21  ;;  %v3057_v20 = vld [vmem:[#allocation5 + $0x16c] ss:$16 sps:$4 sm:$0xff]  }
  0xac   :  { %1839 = vmatprep.subr.bf16.mxu1 %v2975_v22  ;;  %v3060_v21 = vld [vmem:[#allocation5 + $0x36c] ss:$16 sps:$4 sm:$0xff]   ;;  %v3055_v22 = vld [vmem:[#allocation5 + $0x168] ss:$16 sps:$4 sm:$0xff]  }
  0xae   :  { %1799 = vmatpush2.bf16.msra.mxu0 %v2970_v23  ;;  %v3058_v23 = vld [vmem:[#allocation5 + $0x368] ss:$16 sps:$4 sm:$0xff]  }
  0xaf   :  { %1840 = vmatpush2.bf16.msra.mxu1 %v2973_v24  ;;  %1800 = vmatprep.subr.bf16.mxu0 %v2978_v25  ;;  %v3063_v24 = vld [vmem:[#allocation5 + $0x14c] ss:$16 sps:$4 sm:$0xff]  }
  0xb0   :  { %1841 = vmatprep.subr.bf16.mxu1 %v2981_v26  ;;  %v3066_v25 = vld [vmem:[#allocation5 + $0x34c] ss:$16 sps:$4 sm:$0xff]   ;;  %v3061_v26 = vld [vmem:[#allocation5 + $0x148] ss:$16 sps:$4 sm:$0xff]  }
  0xb2   :  { %1801 = vmatpush2.bf16.msra.mxu0 %v2976_v27  ;;  %v3064_v27 = vld [vmem:[#allocation5 + $0x348] ss:$16 sps:$4 sm:$0xff]  }
  0xb3   :  { %1842 = vmatpush2.bf16.msra.mxu1 %v2979_v28  ;;  %1852 = vmatprep.subr.bf16.mxu0 %v2985_v29  ;;  %v3069_v28 = vld [vmem:[#allocation5 + $0x12c] ss:$16 sps:$4 sm:$0xff]  }
  0xb4   :  { %1893 = vmatprep.subr.bf16.mxu1 %v2988_v30  ;;  %v3072_v29 = vld [vmem:[#allocation5 + $0x32c] ss:$16 sps:$4 sm:$0xff]   ;;  %v3067_v30 = vld [vmem:[#allocation5 + $0x128] ss:$16 sps:$4 sm:$0xff]  }
  0xb5   :  { %1803 = vmatmul.mubr.bf16.vlgmr.msra.gmra.mxu0 %v3422_v31 }
  0xb6   :  { %1844 = vmatmul.mubr.bf16.vlgmr.msra.gmra.mxu1 %v3426_v32  ;;  %1853 = vmatpush1.bf16.msra.mxu0 %v2983_v33  ;;  %v3070_v33 = vld [vmem:[#allocation5 + $0x328] ss:$16 sps:$4 sm:$0xff]  }
  0xb7   :  { %1894 = vmatpush1.bf16.msra.mxu1 %v2986_v34  ;;  %1854 = vmatprep.subr.bf16.mxu0 %v2991_v35  ;;  %v3075_v34 = vld [vmem:[#allocation5 + $0x10c] ss:$16 sps:$4 sm:$0xff]  }
  0xb8   :  { %1895 = vmatprep.subr.bf16.mxu1 %v2994_v36  ;;  %1884 = vmatprep.mubr.bf16.mxu0 %v3392_v62  ;;  %v3007_v62 = vld [vmem:[#allocation5 + $0x68] ss:$16 sps:$4 sm:$0xff]   ;;  %v3078_v35 = vld [vmem:[#allocation5 + $0x30c] ss:$16 sps:$4 sm:$0xff]  }
  0xb9   :  { %1925 = vmatprep.mubr.bf16.mxu1 %v3394_v3  ;;  %v3010_v3 = vld [vmem:[#allocation5 + $0x268] ss:$16 sps:$4 sm:$0xff]  }
  0xba   :  { %1855 = vmatpush1.bf16.msra.mxu0 %v2989_v37  ;;  %v3073_v36 = vld [vmem:[#allocation5 + $0x108] ss:$16 sps:$4 sm:$0xff]  }
  0xbb   :  { %1896 = vmatpush1.bf16.msra.mxu1 %v2992_v38  ;;  %1856 = vmatprep.subr.bf16.mxu0 %v2997_v39  ;;  %v3076_v37 = vld [vmem:[#allocation5 + $0x308] ss:$16 sps:$4 sm:$0xff]   ;;  %v3081_v38 = vld [vmem:[#allocation5 + $0x4ec] ss:$16 sps:$4 sm:$0xff]  }
  0xbc   :  { %1897 = vmatprep.subr.bf16.mxu1 %v3000_v40  ;;  %v3084_v39 = vld [vmem:[#allocation5 + $0x6ec] ss:$16 sps:$4 sm:$0xff]   ;;  %v3079_v40 = vld [vmem:[#allocation5 + $0x4e8] ss:$16 sps:$4 sm:$0xff]  }
  0xbe   :  { %1857 = vmatpush1.bf16.msra.mxu0 %v2995_v41  ;;  %v3082_v41 = vld [vmem:[#allocation5 + $0x6e8] ss:$16 sps:$4 sm:$0xff]  }
  0xbf   :  { %1898 = vmatpush1.bf16.msra.mxu1 %v2998_v42  ;;  %1858 = vmatprep.subr.bf16.mxu0 %v3003_v44  ;;  %v3087_v42 = vld [vmem:[#allocation5 + $0x4cc] ss:$16 sps:$4 sm:$0xff]  }
  0xc0   :  { %1899 = vmatprep.subr.bf16.mxu1 %v3006_v45  ;;  %v3090_v44 = vld [vmem:[#allocation5 + $0x6cc] ss:$16 sps:$4 sm:$0xff]   ;;  %v3085_v45 = vld [vmem:[#allocation5 + $0x4c8] ss:$16 sps:$4 sm:$0xff]  }
  0xc2   :  { %1859 = vmatpush1.bf16.msra.mxu0 %v3001_v46  ;;  %v3088_v46 = vld [vmem:[#allocation5 + $0x6c8] ss:$16 sps:$4 sm:$0xff]  }
  0xc3   :  { %1900 = vmatpush1.bf16.msra.mxu1 %v3004_v47  ;;  %1860 = vmatprep.subr.bf16.mxu0 %v3009_v48  ;;  %v3093_v47 = vld [vmem:[#allocation5 + $0x4ac] ss:$16 sps:$4 sm:$0xff]  }
  0xc4   :  { %1901 = vmatprep.subr.bf16.mxu1 %v3012_v50  ;;  %v3096_v48 = vld [vmem:[#allocation5 + $0x6ac] ss:$16 sps:$4 sm:$0xff]   ;;  %v3091_v50 = vld [vmem:[#allocation5 + $0x4a8] ss:$16 sps:$4 sm:$0xff]  }
  0xc6   :  { %1861 = vmatpush1.bf16.msra.mxu0 %v3007_v62  ;;  %v3094_v62 = vld [vmem:[#allocation5 + $0x6a8] ss:$16 sps:$4 sm:$0xff]  }
  0xc7   :  { %1902 = vmatpush1.bf16.msra.mxu1 %v3010_v3  ;;  %1862 = vmatprep.subr.bf16.mxu0 %v3015_v51  ;;  %v3097_v3 = vld [vmem:[#allocation5 + $0x488] ss:$16 sps:$4 sm:$0xff]  }
  0xc8   :  { %1903 = vmatprep.subr.bf16.mxu1 %v3018_v52  ;;  %v3100_v51 = vld [vmem:[#allocation5 + $0x688] ss:$16 sps:$4 sm:$0xff]   ;;  %v3105_v52 = vld [vmem:[#allocation5 + $0x46c] ss:$16 sps:$4 sm:$0xff]  }
  0xca   :  { %1863 = vmatpush1.bf16.msra.mxu0 %v3013_v54  ;;  %v3108_v54 = vld [vmem:[#allocation5 + $0x66c] ss:$16 sps:$4 sm:$0xff]  }
  0xcb   :  { %1904 = vmatpush1.bf16.msra.mxu1 %v3016_v55  ;;  %1864 = vmatprep.subr.bf16.mxu0 %v3021_v56  ;;  %v3111_v55 = vld [vmem:[#allocation5 + $0x44c] ss:$16 sps:$4 sm:$0xff]  }
  0xcc   :  { %1905 = vmatprep.subr.bf16.mxu1 %v3024_v58  ;;  %v3114_v56 = vld [vmem:[#allocation5 + $0x64c] ss:$16 sps:$4 sm:$0xff]   ;;  %v3109_v58 = vld [vmem:[#allocation5 + $0x448] ss:$16 sps:$4 sm:$0xff]  }
  0xce   :  { %1865 = vmatpush1.bf16.msra.mxu0 %v3019_v49  ;;  %v3112_v49 = vld [vmem:[#allocation5 + $0x648] ss:$16 sps:$4 sm:$0xff]  }
  0xcf   :  { %1906 = vmatpush1.bf16.msra.mxu1 %v3022_v59  ;;  %1866 = vmatprep.subr.bf16.mxu0 %v3027_v60  ;;  %v3117_v59 = vld [vmem:[#allocation5 + $0x42c] ss:$16 sps:$4 sm:$0xff]  }
  0xd0   :  { %1907 = vmatprep.subr.bf16.mxu1 %v3030_v61  ;;  %v3120_v60 = vld [vmem:[#allocation5 + $0x62c] ss:$16 sps:$4 sm:$0xff]   ;;  %v3115_v61 = vld [vmem:[#allocation5 + $0x428] ss:$16 sps:$4 sm:$0xff]  }
  0xd2   :  { %1867 = vmatpush1.bf16.msra.mxu0 %v3025_v63  ;;  %v3118_v63 = vld [vmem:[#allocation5 + $0x628] ss:$16 sps:$4 sm:$0xff]  }
  0xd3   :  { %1908 = vmatpush1.bf16.msra.mxu1 %v3028_v0  ;;  %1868 = vmatprep.subr.bf16.mxu0 %v3033_v1  ;;  %v3123_v0 = vld [vmem:[#allocation5 + $0x40c] ss:$16 sps:$4 sm:$0xff]  }
  0xd4   :  { %1909 = vmatprep.subr.bf16.mxu1 %v3036_v2  ;;  %v3126_v1 = vld [vmem:[#allocation5 + $0x60c] ss:$16 sps:$4 sm:$0xff]   ;;  %v3121_v2 = vld [vmem:[#allocation5 + $0x408] ss:$16 sps:$4 sm:$0xff]  }
  0xd6   :  { %1869 = vmatpush2.bf16.msra.mxu0 %v3031_v4  ;;  %v3124_v4 = vld [vmem:[#allocation5 + $0x608] ss:$16 sps:$4 sm:$0xff]  }
  0xd7   :  { %1910 = vmatpush2.bf16.msra.mxu1 %v3034_v5  ;;  %1870 = vmatprep.subr.bf16.mxu0 %v3039_v6  ;;  %v3129_v5 = vld [vmem:[#allocation5 + $0x5ec] ss:$16 sps:$4 sm:$0xff]  }
  0xd8   :  { %1911 = vmatprep.subr.bf16.mxu1 %v3042_v7  ;;  %v3132_v6 = vld [vmem:[#allocation5 + $0x7ec] ss:$16 sps:$4 sm:$0xff]   ;;  %v3127_v7 = vld [vmem:[#allocation5 + $0x5e8] ss:$16 sps:$4 sm:$0xff]  }
  0xda   :  { %1871 = vmatpush2.bf16.msra.mxu0 %v3037_v8  ;;  %v3130_v8 = vld [vmem:[#allocation5 + $0x7e8] ss:$16 sps:$4 sm:$0xff]  }
  0xdb   :  { %1912 = vmatpush2.bf16.msra.mxu1 %v3040_v9  ;;  %1872 = vmatprep.subr.bf16.mxu0 %v3045_v10  ;;  %v3135_v9 = vld [vmem:[#allocation5 + $0x5cc] ss:$16 sps:$4 sm:$0xff]  }
  0xdc   :  { %1913 = vmatprep.subr.bf16.mxu1 %v3048_v11  ;;  %v3138_v10 = vld [vmem:[#allocation5 + $0x7cc] ss:$16 sps:$4 sm:$0xff]   ;;  %v3133_v11 = vld [vmem:[#allocation5 + $0x5c8] ss:$16 sps:$4 sm:$0xff]  }
  0xde   :  { %1873 = vmatpush2.bf16.msra.mxu0 %v3043_v12  ;;  %v3136_v12 = vld [vmem:[#allocation5 + $0x7c8] ss:$16 sps:$4 sm:$0xff]  }
  0xdf   :  { %1914 = vmatpush2.bf16.msra.mxu1 %v3046_v13  ;;  %1874 = vmatprep.subr.bf16.mxu0 %v3051_v14  ;;  %v3141_v13 = vld [vmem:[#allocation5 + $0x5ac] ss:$16 sps:$4 sm:$0xff]  }
  0xe0   :  { %1915 = vmatprep.subr.bf16.mxu1 %v3054_v15  ;;  %v3144_v14 = vld [vmem:[#allocation5 + $0x7ac] ss:$16 sps:$4 sm:$0xff]   ;;  %v3139_v15 = vld [vmem:[#allocation5 + $0x5a8] ss:$16 sps:$4 sm:$0xff]  }
  0xe2   :  { %1875 = vmatpush2.bf16.msra.mxu0 %v3049_v18  ;;  %v3142_v18 = vld [vmem:[#allocation5 + $0x7a8] ss:$16 sps:$4 sm:$0xff]  }
  0xe3   :  { %1916 = vmatpush2.bf16.msra.mxu1 %v3052_v19  ;;  %1876 = vmatprep.subr.bf16.mxu0 %v3057_v20  ;;  %v3147_v19 = vld [vmem:[#allocation5 + $0x58c] ss:$16 sps:$4 sm:$0xff]  }
  0xe4   :  { %1917 = vmatprep.subr.bf16.mxu1 %v3060_v21  ;;  %v3150_v20 = vld [vmem:[#allocation5 + $0x78c] ss:$16 sps:$4 sm:$0xff]   ;;  %v3145_v21 = vld [vmem:[#allocation5 + $0x588] ss:$16 sps:$4 sm:$0xff]  }
  0xe6   :  { %1877 = vmatpush2.bf16.msra.mxu0 %v3055_v22  ;;  %v3148_v22 = vld [vmem:[#allocation5 + $0x788] ss:$16 sps:$4 sm:$0xff]  }
  0xe7   :  { %1918 = vmatpush2.bf16.msra.mxu1 %v3058_v23  ;;  %1878 = vmatprep.subr.bf16.mxu0 %v3063_v24  ;;  %v3153_v23 = vld [vmem:[#allocation5 + $0x56c] ss:$16 sps:$4 sm:$0xff]  }
  0xe8   :  { %1919 = vmatprep.subr.bf16.mxu1 %v3066_v25  ;;  %v3156_v24 = vld [vmem:[#allocation5 + $0x76c] ss:$16 sps:$4 sm:$0xff]   ;;  %v3151_v25 = vld [vmem:[#allocation5 + $0x568] ss:$16 sps:$4 sm:$0xff]  }
  0xea   :  { %1879 = vmatpush2.bf16.msra.mxu0 %v3061_v26  ;;  %v3154_v26 = vld [vmem:[#allocation5 + $0x768] ss:$16 sps:$4 sm:$0xff]  }
  0xeb   :  { %1920 = vmatpush2.bf16.msra.mxu1 %v3064_v27  ;;  %1880 = vmatprep.subr.bf16.mxu0 %v3069_v28  ;;  %v3159_v27 = vld [vmem:[#allocation5 + $0x54c] ss:$16 sps:$4 sm:$0xff]  }
  0xec   :  { %1921 = vmatprep.subr.bf16.mxu1 %v3072_v29  ;;  %v3162_v28 = vld [vmem:[#allocation5 + $0x74c] ss:$16 sps:$4 sm:$0xff]   ;;  %v3157_v29 = vld [vmem:[#allocation5 + $0x548] ss:$16 sps:$4 sm:$0xff]  }
  0xee   :  { %1881 = vmatpush2.bf16.msra.mxu0 %v3067_v30  ;;  %v3160_v30 = vld [vmem:[#allocation5 + $0x748] ss:$16 sps:$4 sm:$0xff]  }
  0xef   :  { %1922 = vmatpush2.bf16.msra.mxu1 %v3070_v33  ;;  %1882 = vmatprep.subr.bf16.mxu0 %v3075_v34  ;;  %v3165_v33 = vld [vmem:[#allocation5 + $0x52c] ss:$16 sps:$4 sm:$0xff]  }
  0xf0   :  { %1923 = vmatprep.subr.bf16.mxu1 %v3078_v35  ;;  %v3168_v34 = vld [vmem:[#allocation5 + $0x72c] ss:$16 sps:$4 sm:$0xff]   ;;  %v3163_v35 = vld [vmem:[#allocation5 + $0x528] ss:$16 sps:$4 sm:$0xff]  }
  0xf2   :  { %1883 = vmatpush2.bf16.msra.mxu0 %v3073_v36  ;;  %v3166_v36 = vld [vmem:[#allocation5 + $0x728] ss:$16 sps:$4 sm:$0xff]  }
  0xf3   :  { %1924 = vmatpush2.bf16.msra.mxu1 %v3076_v37  ;;  %1934 = vmatprep.subr.bf16.mxu0 %v3081_v38  ;;  %v3171_v37 = vld [vmem:[#allocation5 + $0x50c] ss:$16 sps:$4 sm:$0xff]  }
  0xf4   :  { %1975 = vmatprep.subr.bf16.mxu1 %v3084_v39  ;;  %v3174_v38 = vld [vmem:[#allocation5 + $0x70c] ss:$16 sps:$4 sm:$0xff]   ;;  %v3169_v39 = vld [vmem:[#allocation5 + $0x508] ss:$16 sps:$4 sm:$0xff]  }
  0xf5   :  { %1885 = vmatmul.mubr.bf16.vlgmr.msra.gmra.mxu0 %v3398_v16  ;;  %v3099_v16 = vld [vmem:[#allocation5 + $0x48c] ss:$16 sps:$4 sm:$0xff]  }
  0xf6   :  { %1926 = vmatmul.mubr.bf16.vlgmr.msra.gmra.mxu1 %v3400_v17  ;;  %1935 = vmatpush1.bf16.msra.mxu0 %v3079_v40  ;;  %v3102_v17 = vld [vmem:[#allocation5 + $0x68c] ss:$16 sps:$4 sm:$0xff]   ;;  %v3172_v40 = vld [vmem:[#allocation5 + $0x708] ss:$16 sps:$4 sm:$0xff]  }
  0xf7   :  { %1976 = vmatpush1.bf16.msra.mxu1 %v3082_v41  ;;  %1936 = vmatprep.subr.bf16.mxu0 %v3087_v42  ;;  %v3175_v41 = vld [vmem:[#allocation8 + $0x78] sm:$0xff]  }
  0xf8   :  { %1977 = vmatprep.subr.bf16.mxu1 %v3090_v44  ;;  %1966 = vmatprep.mubr.bf16.mxu0 %v3412_v53  ;;  %v3103_v53 = vld [vmem:[#allocation5 + $0x468] ss:$16 sps:$4 sm:$0xff]   ;;  %v3176_v42 = vld [vmem:[#allocation8 + $0x38] sm:$0xff]  }
  0xf9   :  { %2007 = vmatprep.mubr.bf16.mxu1 %v3416_v57  ;;  %v3106_v57 = vld [vmem:[#allocation5 + $0x668] ss:$16 sps:$4 sm:$0xff]  }
  0xfa   :  { %1937 = vmatpush1.bf16.msra.mxu0 %v3085_v45  ;;  %v3177_v44 = vld [vmem:[#allocation8 + $0x70] sm:$0xff]  }
  0xfb   :  { %1978 = vmatpush1.bf16.msra.mxu1 %v3088_v46  ;;  %1938 = vmatprep.subr.bf16.mxu0 %v3093_v47  ;;  %v3178_v47 = vld [vmem:[#allocation8 + $0x30] sm:$0xff]  }
  0xfc   :  { %1979 = vmatprep.subr.bf16.mxu1 %v3096_v48 }
  0xfe   :  { %1939 = vmatpush1.bf16.msra.mxu0 %v3091_v50 }
  0xff   :  { %1980 = vmatpush1.bf16.msra.mxu1 %v3094_v62  ;;  %1940 = vmatprep.subr.bf16.mxu0 %v3099_v16  ;;  %v3179_v62 = vld [vmem:[#allocation8 + $0x68] sm:$0xff]  }
 0x100   :  { %1981 = vmatprep.subr.bf16.mxu1 %v3102_v17 }
 0x102   :  { %1941 = vmatpush1.bf16.msra.mxu0 %v3097_v3  ;;  %v3180_v3 = vld [vmem:[#allocation8 + $0x28] sm:$0xff]  }
 0x103   :  { %1982 = vmatpush1.bf16.msra.mxu1 %v3100_v51  ;;  %1942 = vmatprep.subr.bf16.mxu0 %v3105_v52 }
 0x104   :  { %1983 = vmatprep.subr.bf16.mxu1 %v3108_v54  ;;  %v3181_v54 = vld [vmem:[#allocation8 + $0x60] sm:$0xff]  }
 0x106   :  { %1943 = vmatpush1.bf16.msra.mxu0 %v3103_v53  ;;  %v3191_v53 = vld [vmem:[#allocation8 + $0xf8] sm:$0xff]  }
 0x107   :  { %1984 = vmatpush1.bf16.msra.mxu1 %v3106_v57  ;;  %1944 = vmatprep.subr.bf16.mxu0 %v3111_v55  ;;  %v3184_v57 = vld [vmem:[#allocation8 + $0x18] sm:$0xff]   ;;  %v3185_v55 = vld [vmem:[#allocation8 + $0x50] sm:$0xff]  }
 0x108   :  { %1985 = vmatprep.subr.bf16.mxu1 %v3114_v56  ;;  %v3186_v56 = vld [vmem:[#allocation8 + $0x10] sm:$0xff]  }
 0x10a   :  { %1945 = vmatpush1.bf16.msra.mxu0 %v3109_v58  ;;  %v3187_v58 = vld [vmem:[#allocation8 + $0x48] sm:$0xff]  }
 0x10b   :  { %1986 = vmatpush1.bf16.msra.mxu1 %v3112_v49  ;;  %1946 = vmatprep.subr.bf16.mxu0 %v3117_v59  ;;  %v3188_v49 = vld [vmem:[#allocation8 + $0x8] sm:$0xff]   ;;  %v3189_v59 = vld [vmem:[#allocation8 + $0x40] sm:$0xff]  }
 0x10c   :  { %1987 = vmatprep.subr.bf16.mxu1 %v3120_v60  ;;  %v3190_v60 = vld [vmem:[#allocation8] sm:$0xff]  }
 0x10e   :  { %1947 = vmatpush1.bf16.msra.mxu0 %v3115_v61  ;;  %v390_v61 = vsub.s32 0, %v3385_v43 }
 0x10f   :  { %1988 = vmatpush1.bf16.msra.mxu1 %v3118_v63  ;;  %1948 = vmatprep.subr.bf16.mxu0 %v3123_v0  ;;  %v3439_v63 = vld [vmem:[#allocation7] sm:$0xf]  ;;  %v394_v0 = vsub.s32 1, %v3385_v43 }
 0x110   :  { %1989 = vmatprep.subr.bf16.mxu1 %v3126_v1  ;;  %v391_v1 = vrot.slane %v3439_v63, %v390_v61 }
 0x112   :  { %1949 = vmatpush1.bf16.msra.mxu0 %v3121_v2  ;;  %v395_v2 = vrot.slane %v3439_v63, %v394_v0 }
 0x113   :  { %1990 = vmatpush1.bf16.msra.mxu1 %v3124_v4  ;;  %1950 = vmatprep.subr.bf16.mxu0 %v3129_v5 }
 0x114   :  { %1991 = vmatprep.subr.bf16.mxu1 %v3132_v6  ;;  %v3192_v6 = vld [vmem:[#allocation8 + $0xb8] sm:$0xff]  }
 0x116   :  { %1951 = vmatpush2.bf16.msra.mxu0 %v3127_v7 }
 0x117   :  { %1992 = vmatpush2.bf16.msra.mxu1 %v3130_v8  ;;  %1952 = vmatprep.subr.bf16.mxu0 %v3135_v9 }
 0x118   :  { %1993 = vmatprep.subr.bf16.mxu1 %v3138_v10 }
 0x11a   :  { %1953 = vmatpush2.bf16.msra.mxu0 %v3133_v11 }
 0x11b   :  { %1994 = vmatpush2.bf16.msra.mxu1 %v3136_v12  ;;  %1954 = vmatprep.subr.bf16.mxu0 %v3141_v13  ;;  %v3193_v12 = vld [vmem:[#allocation8 + $0xf0] sm:$0xff]  }
 0x11c   :  { %1995 = vmatprep.subr.bf16.mxu1 %v3144_v14 }
 0x11e   :  { %1955 = vmatpush2.bf16.msra.mxu0 %v3139_v15  ;;  %v3194_v15 = vld [vmem:[#allocation8 + $0xb0] sm:$0xff]  }
 0x11f   :  { %1996 = vmatpush2.bf16.msra.mxu1 %v3142_v18  ;;  %1956 = vmatprep.subr.bf16.mxu0 %v3147_v19 }
 0x120   :  { %1997 = vmatprep.subr.bf16.mxu1 %v3150_v20 }
 0x122   :  { %1957 = vmatpush2.bf16.msra.mxu0 %v3145_v21 }
 0x123   :  { %1998 = vmatpush2.bf16.msra.mxu1 %v3148_v22  ;;  %1958 = vmatprep.subr.bf16.mxu0 %v3153_v23 }
 0x124   :  { %1999 = vmatprep.subr.bf16.mxu1 %v3156_v24  ;;  %v3195_v24 = vld [vmem:[#allocation8 + $0xe8] sm:$0xff]  }
 0x126   :  { %1959 = vmatpush2.bf16.msra.mxu0 %v3151_v25 }
 0x127   :  { %2000 = vmatpush2.bf16.msra.mxu1 %v3154_v26  ;;  %1960 = vmatprep.subr.bf16.mxu0 %v3159_v27  ;;  %v3196_v27 = vld [vmem:[#allocation8 + $0xa8] sm:$0xff]  }
 0x128   :  { %2001 = vmatprep.subr.bf16.mxu1 %v3162_v28 }
 0x12a   :  { %1961 = vmatpush2.bf16.msra.mxu0 %v3157_v29  ;;  %v3197_v29 = vld [vmem:[#allocation8 + $0xe0] sm:$0xff]  }
 0x12b   :  { %2002 = vmatpush2.bf16.msra.mxu1 %v3160_v30  ;;  %1962 = vmatprep.subr.bf16.mxu0 %v3165_v33  ;;  %v3198_v30 = vld [vmem:[#allocation8 + $0xa0] sm:$0xff]   ;;  %v3199_v33 = vld [vmem:[#allocation8 + $0xd8] sm:$0xff]  }
 0x12c   :  { %2003 = vmatprep.subr.bf16.mxu1 %v3168_v34  ;;  %v3200_v34 = vld [vmem:[#allocation8 + $0x98] sm:$0xff]  }
 0x12e   :  { %1963 = vmatpush2.bf16.msra.mxu0 %v3163_v35  ;;  %v3201_v35 = vld [vmem:[#allocation8 + $0xd0] sm:$0xff]  }
 0x12f   :  { %2004 = vmatpush2.bf16.msra.mxu1 %v3166_v36  ;;  %1964 = vmatprep.subr.bf16.mxu0 %v3171_v37  ;;  %v3202_v36 = vld [vmem:[#allocation8 + $0x90] sm:$0xff]  }
 0x130   :  { %2005 = vmatprep.subr.bf16.mxu1 %v3174_v38 }
 0x132   :  { %1965 = vmatpush2.bf16.msra.mxu0 %v3169_v39  ;;  %v3203_v39 = vld [vmem:[#allocation8 + $0xc8] sm:$0xff]  }
 0x133   :  { %2006 = vmatpush2.bf16.msra.mxu1 %v3172_v40  ;;  %2732 = vmatprep.subr.bf16.mxu0 %v3175_v41  ;;  %v3204_v41 = vld [vmem:[#allocation8 + $0x88] sm:$0xff]  }
 0x134   :  { %2754 = vmatprep.subr.bf16.mxu1 %v3191_v53 }
 0x135   :  { %v1722_v45 = vpop.f32.mrf.mxu0  ;;  %1967 = vmatmul.mubr.bf16.vlgmr.msra.gmra.mxu0 %v3422_v31  ;;  %v3182_v31 = vld [vmem:[#allocation8 + $0x20] sm:$0xff]  }
 0x136   :  { %v1763_v46 = vpop.f32.mrf.mxu1  ;;  %2008 = vmatmul.mubr.bf16.vlgmr.msra.gmra.mxu1 %v3426_v32  ;;  %2733 = vmatpush3.bf16.msra.mxu0 %v3176_v42  ;;  %v3183_v32 = vld [vmem:[#allocation8 + $0x58] sm:$0xff]   ;;  %v1723_v4 = vadd.f32 %v1722_v45, %v391_v1 }
 0x137   :  { %v1724_v48 = vpop.f32.mrf.mxu0  ;;  %2734 = vmatprep.subr.bf16.mxu0 %v3177_v44  ;;  %2755 = vmatpush3.bf16.msra.mxu1 %v3192_v6 }
 0x138   :  { %v1765_v50 = vpop.f32.mrf.mxu1  ;;  %v1725_v5 = vadd.f32 %v1724_v48, %v395_v2  ;;  %v1764_v7 = vadd.f32 %v1763_v46, %v1723_v4  ;;  %2756 = vmatprep.subr.bf16.mxu1 %v3193_v12  ;;  %v3205_v46 = vld [vmem:[#allocation8 + $0xc0] sm:$0xff]  }
 0x139   :  { %v1726_v16 = vpop.f32.mrf.mxu0  ;;  %v3206_v48 = vld [vmem:[#allocation8 + $0x80] sm:$0xff]  }
 0x13a   :  { %v1767_v17 = vpop.f32.mrf.mxu1  ;;  %2735 = vmatpush3.bf16.msra.mxu0 %v3178_v47  ;;  %v1766_v10 = vadd.f32 %v1765_v50, %v1725_v5 }
 0x13b   :  { %v1727_v51 = vpop.f32.mrf.mxu0  ;;  %2736 = vmatprep.subr.bf16.mxu0 %v3179_v62  ;;  %2757 = vmatpush3.bf16.msra.mxu1 %v3194_v15 }
 0x13c   :  { %v1768_v52 = vpop.f32.mrf.mxu1  ;;  %2758 = vmatprep.subr.bf16.mxu1 %v3195_v24 }
 0x13e   :  { %2737 = vmatpush3.bf16.msra.mxu0 %v3180_v3 }
 0x13f   :  { %2738 = vmatprep.subr.bf16.mxu0 %v3181_v54  ;;  %2759 = vmatpush3.bf16.msra.mxu1 %v3196_v27 }
 0x140   :  { %2760 = vmatprep.subr.bf16.mxu1 %v3197_v29 }
 0x142   :  { %2739 = vmatpush3.bf16.msra.mxu0 %v3182_v31 }
 0x143   :  { %2740 = vmatprep.subr.bf16.mxu0 %v3183_v32  ;;  %2761 = vmatpush3.bf16.msra.mxu1 %v3198_v30 }
 0x144   :  { %2762 = vmatprep.subr.bf16.mxu1 %v3199_v33  ;;  %v2698_v33 = vld [vmem:[%s3463_s4] ss:$0 sm:$0xff]  ;;  %s3336_s4 = smov 96  }
 0x146   :  { %2741 = vmatpush3.bf16.msra.mxu0 %v3184_v57  ;;  %v2389_v57 = vld [vmem:[%s3464_s5] sm:$0x3] }
 0x147   :  { %2742 = vmatprep.subr.bf16.mxu0 %v3185_v55  ;;  %2763 = vmatpush3.bf16.msra.mxu1 %v3200_v34  ;;  %v398_v55 = vsub.s32 2, %v3385_v43 }
 0x148   :  { %2764 = vmatprep.subr.bf16.mxu1 %v3201_v35  ;;  %2391 = vrot.lane.b32.xlu1 %v2389_v57, %s3334_s19 }
 0x14a   :  { %2743 = vmatpush3.bf16.msra.mxu0 %v3186_v56  ;;  %v402_v56 = vsub.s32 3, %v3385_v43 }
 0x14b   :  { %2744 = vmatprep.subr.bf16.mxu0 %v3187_v58  ;;  %2765 = vmatpush3.bf16.msra.mxu1 %v3202_v36  ;;  %v399_v58 = vrot.slane %v3439_v63, %v398_v55 }
 0x14c   :  { %2766 = vmatprep.subr.bf16.mxu1 %v3203_v39 }
 0x14e   :  { %2745 = vmatpush3.bf16.msra.mxu0 %v3188_v49  ;;  %v403_v49 = vrot.slane %v3439_v63, %v402_v56 }
 0x14f   :  { %2746 = vmatprep.subr.bf16.mxu0 %v3189_v59  ;;  %2767 = vmatpush3.bf16.msra.mxu1 %v3204_v41 }
 0x150   :  { %2768 = vmatprep.subr.bf16.mxu1 %v3205_v46  ;;  %v3335_v46 = vmov 0.0  }
 0x151   :  { %2417 = vst [vmem:[#allocation10] sm:$0x3] %v3335_v46 }
 0x152   :  { %2747 = vmatpush3.bf16.msra.mxu0 %v3190_v60 }
 0x153   :  { %2769 = vmatpush3.bf16.msra.mxu1 %v3206_v48 }
 0x175   :  { %v1804_v8 = vpop.f32.mrf.mxu0 }
 0x176   :  { %v1845_v9 = vpop.f32.mrf.mxu1  ;;  %v1805_v11 = vadd.f32 %v1804_v8, %v1764_v7 }
 0x177   :  { %v1806_v13 = vpop.f32.mrf.mxu0 }
 0x178   :  { %v1847_v14 = vpop.f32.mrf.mxu1  ;;  %v1846_v18 = vadd.f32 %v1845_v9, %v1805_v11  ;;  %v1807_v19 = vadd.f32 %v1806_v13, %v1766_v10 }
 0x179   :  { %v1808_v20 = vpop.f32.mrf.mxu0 }
 0x17a   :  { %v1849_v21 = vpop.f32.mrf.mxu1  ;;  %v2020_v22 = vmul.f32 1.442695, %v1846_v18  ;;  %v1848_v23 = vadd.f32 %v1847_v14, %v1807_v19  ;;  %vm2016_vm0 = vcmp.gt.f32.partialorder %v1846_v18, 0.0 }
 0x17b   :  { %v1809_v25 = vpop.f32.mrf.mxu0 }
 0x17c   :  { %v1850_v26 = vpop.f32.mrf.mxu1  ;;  %3207 = vpow2.f32 %v2020_v22  ;;  %v2022_v28 = vmul.f32 1.442695, %v1848_v23  ;;  %vm2017_vm1 = vcmp.gt.f32.partialorder %v1848_v23, 0.0 }
 0x17e   :  { %3209 = vpow2.f32 %v2022_v28 }
 0x189   :  { %v3208_v37 = vpop.eup %3207 }
 0x18a   :  { %v2694_v38 = vadd.f32 -1.0, %v3208_v37 }
 0x18b   :  { %v3210_v40 = vpop.eup %3209 }
 0x18c   :  { %v2032_v42 = vmul.f32 1.6732632, %v2694_v38  ;;  %v2695_v44 = vadd.f32 -1.0, %v3210_v40 }
 0x18e   :  { %v2033_v45 = vmul.f32 1.6732632, %v2695_v44  ;;  %v2036_v47 = vsel %vm2016_vm0, %v1846_v18, %v2032_v42 }
 0x18f   :  { %v2040_v16 = vpack.c.bf16 %v2036_v47, %v2036_v47 }
 0x190   :  { %v2037_v50 = vsel %vm2017_vm1, %v1848_v23, %v2033_v45 }
 0x191   :  { %v2041_v62 = vpack.c.bf16 %v2037_v50, %v2037_v50 }
 0x193   :  { %2339 = vmatprep.mubr.bf16.mxu0 %v2041_v62 }
 0x194   :  { %2340 = vmatmul.mubr.bf16.vlgmr.msra.gmra.mxu0 %v2040_v16 }
 0x1b5   :  { %v1886_v17 = vpop.f32.mrf.mxu0 }
 0x1b6   :  { %v1927_v3 = vpop.f32.mrf.mxu1  ;;  %v1887_v59 = vadd.f32 %v1886_v17, %v399_v58 }
 0x1b7   :  { %v1888_v51 = vpop.f32.mrf.mxu0 }
 0x1b8   :  { %v1929_v52 = vpop.f32.mrf.mxu1  ;;  %v1889_v60 = vadd.f32 %v1888_v51, %v403_v49  ;;  %v1928_v61 = vadd.f32 %v1927_v3, %v1887_v59 }
 0x1b9   :  { %v1890_v54 = vpop.f32.mrf.mxu0 }
 0x1ba   :  { %v1931_v53 = vpop.f32.mrf.mxu1  ;;  %v1930_v2 = vadd.f32 %v1929_v52, %v1889_v60  ;;  %v2392_v16 = vpop.permute.xlu1 %2391 }
 0x1bb   :  { %v1891_v31 = vpop.f32.mrf.mxu0 }
 0x1bc   :  { %v1932_v32 = vpop.f32.mrf.mxu1 }
 0x1f5   :  { %v1968_v0 = vpop.f32.mrf.mxu0 }
 0x1f6   :  { %v2009_v1 = vpop.f32.mrf.mxu1  ;;  %v1969_v4 = vadd.f32 %v1968_v0, %v1928_v61 }
 0x1f7   :  { %v1970_v5 = vpop.f32.mrf.mxu0 }
 0x1f8   :  { %v2011_v6 = vpop.f32.mrf.mxu1  ;;  %v2010_v7 = vadd.f32 %v2009_v1, %v1969_v4  ;;  %v1971_v8 = vadd.f32 %v1970_v5, %v1930_v2 }
 0x1f9   :  { %v1972_v9 = vpop.f32.mrf.mxu0 }
 0x1fa   :  { %v2013_v10 = vpop.f32.mrf.mxu1  ;;  %v2024_v11 = vmul.f32 1.442695, %v2010_v7  ;;  %v2012_v12 = vadd.f32 %v2011_v6, %v1971_v8  ;;  %vm2018_vm2 = vcmp.gt.f32.partialorder %v2010_v7, 0.0 }
 0x1fb   :  { %v1973_v43 = vpop.f32.mrf.mxu0 }
 0x1fc   :  { %v2014_v13 = vpop.f32.mrf.mxu1  ;;  %3211 = vpow2.f32 %v2024_v11  ;;  %v2026_v14 = vmul.f32 1.442695, %v2012_v12  ;;  %vm2019_vm3 = vcmp.gt.f32.partialorder %v2012_v12, 0.0 }
 0x1fe   :  { %3213 = vpow2.f32 %v2026_v14 }
 0x209   :  { %v3212_v63 = vpop.eup %3211 }
 0x20a   :  { %v2696_v15 = vadd.f32 -1.0, %v3212_v63 }
 0x20b   :  { %v3214_v18 = vpop.eup %3213 }
 0x20c   :  { %v2034_v19 = vmul.f32 1.6732632, %v2696_v15  ;;  %v2697_v20 = vadd.f32 -1.0, %v3214_v18 }
 0x20e   :  { %v2035_v21 = vmul.f32 1.6732632, %v2697_v20  ;;  %v2038_v22 = vsel %vm2018_vm2, %v2010_v7, %v2034_v19 }
 0x20f   :  { %v2042_v25 = vpack.c.bf16 %v2038_v22, %v2038_v22 }
 0x210   :  { %v2039_v23 = vsel %vm2019_vm3, %v2012_v12, %v2035_v21 }
 0x211   :  { %v2043_v24 = vpack.c.bf16 %v2039_v23, %v2039_v23 }
 0x213   :  { %2379 = vmatprep.mubr.bf16.mxu1 %v2043_v24 }
 0x214   :  { %2380 = vmatmul.mubr.bf16.vlgmr.msra.gmra.mxu1 %v2042_v25 }
 0x254   :  { %v2748_v26 = vpop.f32.mrf.mxu0 }
 0x256   :  { %v2749_v27 = vpop.f32.mrf.mxu0 }
 0x257   :  { %v2750_v28 = vadd.f32 %v2749_v27, %v2748_v26 }
 0x258   :  { %v2751_v29 = vpop.f32.mrf.mxu0 }
 0x259   :  { %v2342_v36 = vadd.f32 %v2750_v28, %v2698_v33 }
 0x25a   :  { %v2752_v30 = vpop.f32.mrf.mxu0 }
 0x2d4   :  { %v2770_v34 = vpop.f32.mrf.mxu1 }
 0x2d6   :  { %v2771_v35 = vpop.f32.mrf.mxu1 }
 0x2d7   :  { %v2772_v37 = vadd.f32 %v2771_v35, %v2770_v34 }
 0x2d8   :  { %v2773_v38 = vpop.f32.mrf.mxu1 }
 0x2d9   :  { %v2382_v39 = vadd.f32 %v2772_v37, %v2342_v36 }
 0x2da   :  { %v2774_v40 = vpop.f32.mrf.mxu1 }
 0x2db   :  { %v2401_v41 = vmul.f32 %v2382_v39, %v2382_v39  ;;  %v2387_v42 = vmul.f32 1.442695, %v2382_v39 }
 0x2dd   :  { %2403 = vrot.lane.b32.xlu0 %v2401_v41, %s3334_s19  ;;  %3215 = vpow2.f32 %v2387_v42 }
 0x2ea   :  { %v3216_v44 = vpop.eup %3215 }
 0x2eb   :  { %v2400_v45 = vmul.f32 %v3216_v44, %v3216_v44  ;;  %v2394_v17 = vmul.f32 %v3216_v44, %v2392_v16 }
 0x34f   :  { %v2404_v47 = vpop.permute.xlu0 %2403 }
 0x350   :  { %v2406_v48 = vadd.f32 %v2404_v47, %v2400_v45 }
 0x352   :  { %v2407_v50 = vsub.f32 %v2406_v48, %v2382_v39 }
 0x354   :  { %v2731_v62 = vadd.f32 -0.5, %v2407_v50 }
 0x356   :  { %2410 = vrot.lane.b32.xlu0 %v2731_v62, %s3336_s4 }
 0x35a   :  { %2396 = vrot.lane.b32.xlu0 %v2394_v17, %s3336_s4 }
 0x3c8   :  { %v2411_v3 = vpop.permute.xlu0 %2410 }
 0x3c9   :  { %v2414_v51 = vsel %vm2413_vm4, %v2411_v3, 0.0 }
 0x3ca   :  { %2415 = vadd.xlane.f32.xlu1 %v2414_v51 }
 0x3cc   :  { %v2397_v52 = vpop.permute.xlu0 %2396 }
 0x3cd   :  { %v2399_v54 = vadd.f32 %v2397_v52, %v2382_v39 }
 0x3cf   :  { %2418 = vst.msk [vmem:[#allocation10] sm:$0x3] %vm2413_vm4, %v2399_v54 }
 0x453   :  { %v2416_v53 = vpop.xlane.xlu1 %2415 }
 0x454   :  { %2420 = vst.msk [vmem:[#allocation10] sm:$0x3] %vm2419_vm5, %v2416_v53 }
 0x455   :  { %3308 = shalt.err (!%p3305_p10)
}
 0x456   :  { %2430 = dma.vmem_to_hbm [thread:$0]  %s2428_s22, 32, %s3465_s6, [#allocation4]  }
 0x457   :  { %3323 = dma.done.wait [#allocation4], 32  }
 0x458   :  { %3324 = vsyncadd [#allocation4], 4294967264 }
 0x459   :  { %2434 = vsyncpa [#allocation3], 1 }
 0x45a   :  { %2435 = vsyncpa [#allocation6], 1 }
 0x45b   :  { %2436 = vsyncpa [#allocation9], 1 }
 0x45c   :  { %2437 = vsyncpa [#allocation4], 1 }

</bundles_post_ra>
